<compile_context>
chip_gen: v7x
topology: tpu7x:2x2x1
jax: 0.10.0
libtpu: 0.0.40
codegen_flags: <defaults>
</compile_context>

<pallas_src>
import functools

import jax
import jax.numpy as jnp
from jax.experimental import pallas as pl
from jax.experimental.pallas import tpu as pltpu


_VMEM_LIMIT_BYTES = 48 * 1024 * 1024  # explicit scoped-VMEM budget (fits v5e/v6e/v7x)


def _round_up(a, b):
    return (a + b - 1) // b * b


# --------------------------- Pallas kernels ---------------------------------

def _offset_conv_kernel(x_ref, w_ref, b_ref, o_ref):
    # DySample offset head: offset = conv1x1(x) * 0.25 + init_pos.
    # 0.25 is pre-folded into w_ref; b_ref holds (bias * 0.25 + init_pos).
    acc = jnp.dot(x_ref[...], w_ref[...], preferred_element_type=jnp.float32)
    o_ref[...] = (acc + b_ref[...]).astype(o_ref.dtype)


def _conv3x3_banded(x_ref, w_ref, th):
    # 3x3 conv over one haloed row-slab as 3 banded matmuls:
    #   x_ref: (1, 1, TH+2, (W+2)*C) bf16     (padded NHWC rows, W*C packed on lanes)
    #   w_ref: (3, (W+2)*C, W*out_ch) bf16    (per-ky banded weight)
    # returns f32 (TH, W*out_ch)
    acc = jnp.zeros((th, w_ref.shape[2]), jnp.float32)
    for ky in range(3):
        xk = x_ref[0, 0, ky:ky + th, :]
        acc = acc + jnp.dot(xk, w_ref[ky], preferred_element_type=jnp.float32)
    return acc


def _conv_stats_kernel(x_ref, w_ref, stats_ref, *, th, hs_valid):
    # Pass 1: per-batch partial sums / sums-of-squares of the conv output
    # (per (w, out_ch) column; reduced to per-channel host-side).
    t = pl.program_id(1)

    @pl.when(t == 0)
    def _():
        stats_ref[...] = jnp.zeros_like(stats_ref)

    acc = _conv3x3_banded(x_ref, w_ref, th)
    # mask rows that only exist because H was padded up to a multiple of TH
    row = jax.lax.broadcasted_iota(jnp.int32, (th, 1), 0) + t * th
    acc = jnp.where(row < hs_valid, acc, 0.0)
    upd = jnp.concatenate(
        [jnp.sum(acc, axis=0, keepdims=True),
         jnp.sum(acc * acc, axis=0, keepdims=True)],
        axis=0,
    )
    stats_ref[0] = stats_ref[0] + upd


def _conv_bn_relu_kernel(x_ref, w_ref, scale_ref, shift_ref, o_ref, *, th):
    # Pass 2: conv (recomputed, stays in registers) + BN affine + ReLU, lane-dense store.
    acc = _conv3x3_banded(x_ref, w_ref, th)
    y = acc * scale_ref[...] + shift_ref[...]
    o_ref[0] = jnp.maximum(y, 0.0).astype(o_ref.dtype)


# --------------------------- kernel wrappers ---------------------------------

def _offset_conv(x_rows, w_mat, b_eff, *, tm_target=512):
    # x_rows: (M, C) bf16, w_mat: (C, C_off) bf16, b_eff: (1, C_off) f32
    M, C = x_rows.shape
    C_off = w_mat.shape[1]
    tm = min(tm_target, _round_up(M, 8))
    Mp = _round_up(M, tm)
    if Mp != M:
        x_rows = jnp.pad(x_rows, ((0, Mp - M), (0, 0)))

    out = pl.pallas_call(
        _offset_conv_kernel,
        out_shape=jax.ShapeDtypeStruct((Mp, C_off), jnp.float32),
        grid=(Mp // tm,),
        in_specs=[
            pl.BlockSpec((tm, C), lambda i: (i, 0)),
            pl.BlockSpec((C, C_off), lambda i: (0, 0)),
            pl.BlockSpec((1, C_off), lambda i: (0, 0)),
        ],
        out_specs=pl.BlockSpec((tm, C_off), lambda i: (i, 0)),
        compiler_params=pltpu.CompilerParams(
            dimension_semantics=("parallel",),
            vmem_limit_bytes=_VMEM_LIMIT_BYTES),
    )(x_rows, w_mat, b_eff)
    return out[:M]


def _conv3x3_bn_relu(x_up_nhwc, w_conv, gamma, beta, *, eps=1e-5, tile_h=64):
    """Fused Conv2d(3x3, pad=1, bias=False) + BatchNorm2d(training) + ReLU."""
    B, Hs, Ws, C = x_up_nhwc.shape
    oc = w_conv.shape[0]
    Wp = Ws + 2
    Wsoc = Ws * oc

    TH = min(tile_h, _round_up(Hs, 8))        # output rows per grid step
    Hpad = _round_up(Hs, TH)
    HT = Hpad // TH

    # haloed row-slabs (host-side; ~(TH+2)/TH duplication instead of 9x im2col)
    xpad = jnp.pad(x_up_nhwc, ((0, 0), (1, Hpad - Hs + 1), (1, 1), (0, 0)))
    tiles = jnp.stack([xpad[:, t * TH: t * TH + TH + 2] for t in range(HT)], axis=1)
    tiles = tiles.reshape(B, HT, TH + 2, Wp * C).astype(jnp.bfloat16)

    # banded conv weights: band[ky][(w_in*C + c), (w_out*oc + o)] = w[o, c, ky, w_in - w_out]
    Wk = jnp.transpose(w_conv, (2, 3, 1, 0)).astype(jnp.float32)   # (3, 3, C, oc)
    bands = []
    for ky in range(3):
        b_ky = jnp.zeros((Wp * C, Wsoc), jnp.float32)
        for kx in range(3):
            p = jnp.eye(Wp, Ws, k=-kx, dtype=jnp.float32)
            b_ky = b_ky + jnp.kron(p, Wk[ky, kx])
        bands.append(b_ky)
    w_band = jnp.stack(bands, axis=0).astype(jnp.bfloat16)          # (3, Wp*C, Ws*oc)

    grid = (B, HT)

    # ---- pass 1: batch statistics (tiny output, per-batch partials -> parallel-safe)
    stats = pl.pallas_call(
        functools.partial(_conv_stats_kernel, th=TH, hs_valid=Hs),
        out_shape=jax.ShapeDtypeStruct((B, 2, Wsoc), jnp.float32),
        grid=grid,
        in_specs=[
            pl.BlockSpec((1, 1, TH + 2, Wp * C), lambda b, t: (b, t, 0, 0)),
            pl.BlockSpec((3, Wp * C, Wsoc), lambda b, t: (0, 0, 0)),
        ],
        out_specs=pl.BlockSpec((1, 2, Wsoc), lambda b, t: (b, 0, 0)),
        compiler_params=pltpu.CompilerParams(
            dimension_semantics=("parallel", "arbitrary"),
            vmem_limit_bytes=_VMEM_LIMIT_BYTES),
    )(tiles, w_band)

    # finalize BN scale/shift host-side (O(out_ch) work)
    cnt = float(B * Hs * Ws)
    stats_pc = stats.sum(axis=0).reshape(2, Ws, oc).sum(axis=1)     # (2, oc)
    mean = stats_pc[0] / cnt
    var = jnp.maximum(stats_pc[1] / cnt - mean * mean, 0.0)         # biased var (PyTorch train)
    inv = jax.lax.rsqrt(var + eps)
    scale = gamma * inv
    shift = beta - mean * scale
    scale_t = jnp.tile(scale, Ws)[None, :]                          # (1, Ws*oc)
    shift_t = jnp.tile(shift, Ws)[None, :]

    # ---- pass 2: conv + BN + ReLU fused, lane-dense (W*oc) stores
    y = pl.pallas_call(
        functools.partial(_conv_bn_relu_kernel, th=TH),
        out_shape=jax.ShapeDtypeStruct((B, Hpad, Wsoc), jnp.float32),
        grid=grid,
        in_specs=[
            pl.BlockSpec((1, 1, TH + 2, Wp * C), lambda b, t: (b, t, 0, 0)),
            pl.BlockSpec((3, Wp * C, Wsoc), lambda b, t: (0, 0, 0)),
            pl.BlockSpec((1, Wsoc), lambda b, t: (0, 0)),
            pl.BlockSpec((1, Wsoc), lambda b, t: (0, 0)),
        ],
        out_specs=pl.BlockSpec((1, TH, Wsoc), lambda b, t: (b, t, 0)),
        compiler_params=pltpu.CompilerParams(
            dimension_semantics=("parallel", "parallel"),
            vmem_limit_bytes=_VMEM_LIMIT_BYTES),
    )(tiles, w_band, scale_t, shift_t)

    y = y[:, :Hs].reshape(B, Hs, Ws, oc)       # free reshape: packed rows == NHWC
    return jnp.transpose(y, (0, 3, 1, 2))      # NCHW to match the PyTorch module


# --------------------------- DySample (lp style) ------------------------------

def _build_sample_grid(offset, H, W, scale, groups):
    # offset: (B, 2*g*s*s, H, W), already 0.25-scaled with init_pos added.
    B = offset.shape[0]
    s, g = scale, groups
    off = offset.reshape(B, 2, g * s * s, H, W)
    cx = jnp.broadcast_to((jnp.arange(W, dtype=jnp.float32) + 0.5)[None, :], (H, W))
    cy = jnp.broadcast_to((jnp.arange(H, dtype=jnp.float32) + 0.5)[:, None], (H, W))
    coords = jnp.stack([cx, cy], axis=0)[None, :, None]              # (1, 2, 1, H, W)
    normalizer = jnp.array([W, H], dtype=jnp.float32).reshape(1, 2, 1, 1, 1)
    norm = 2.0 * (coords + off) / normalizer - 1.0
    # pixel_shuffle: channel (2, g, s, s) -> spatial sub-positions
    norm = norm.reshape(B, 2, g, s, s, H, W)
    norm = jnp.transpose(norm, (0, 2, 5, 3, 6, 4, 1))                # (B, g, H, s, W, s, 2)
    return norm.reshape(B, g, s * H, s * W, 2)


def _grid_sample_border(x, grid, scale, groups):
    # F.grid_sample(bilinear, align_corners=False, padding_mode='border'), NHWC output.
    # TODO(synk): the data-dependent per-pixel bilinear gather has no clean Pallas TPU
    # equivalent here; the 4-tap gather stays in plain JAX (XLA gather).
    B, C, H, W = x.shape
    g, s = groups, scale
    Cg = C // g
    gx, gy = grid[..., 0], grid[..., 1]
    ix = jnp.clip(((gx + 1.0) * W - 1.0) * 0.5, 0.0, W - 1.0)
    iy = jnp.clip(((gy + 1.0) * H - 1.0) * 0.5, 0.0, H - 1.0)
    x0 = jnp.floor(ix)
    y0 = jnp.floor(iy)
    wx1 = ix - x0
    wy1 = iy - y0
    wx0 = 1.0 - wx1
    wy0 = 1.0 - wy1
    x0i = jnp.clip(x0.astype(jnp.int32), 0, W - 1)
    y0i = jnp.clip(y0.astype(jnp.int32), 0, H - 1)
    x1i = jnp.clip(x0.astype(jnp.int32) + 1, 0, W - 1)
    y1i = jnp.clip(y0.astype(jnp.int32) + 1, 0, H - 1)

    flat = x.reshape(B, g, Cg, H * W)

    def gather(yi, xi):
        idx = (yi * W + xi).reshape(B, g, 1, -1)
        idx = jnp.broadcast_to(idx, (B, g, Cg, idx.shape[-1]))
        v = jnp.take_along_axis(flat, idx, axis=-1)
        return v.reshape(B, g, Cg, s * H, s * W)

    out = (gather(y0i, x0i) * (wy0 * wx0)[:, :, None]
           + gather(y0i, x1i) * (wy0 * wx1)[:, :, None]
           + gather(y1i, x0i) * (wy1 * wx0)[:, :, None]
           + gather(y1i, x1i) * (wy1 * wx1)[:, :, None])
    return jnp.transpose(out, (0, 3, 4, 1, 2)).reshape(B, s * H, s * W, C)   # NHWC


def _dysample_lp(x, w_off, b_off, init_pos, scale, groups):
    B, C, H, W = x.shape
    s, g = scale, groups
    C_off = 2 * g * s * s

    # 1x1 offset conv (Pallas matmul); 0.25 folded into the weight, init_pos into the bias.
    x_rows = jnp.transpose(x, (0, 2, 3, 1)).reshape(B * H * W, C).astype(jnp.bfloat16)
    w_mat = (0.25 * w_off).T.astype(jnp.bfloat16)                    # (C, C_off)
    b_eff = (0.25 * b_off + init_pos)[None, :]                       # (1, C_off) f32
    off_rows = _offset_conv(x_rows, w_mat, b_eff)
    offset = off_rows.reshape(B, H, W, C_off).transpose(0, 3, 1, 2)  # NCHW offsets

    grid_n = _build_sample_grid(offset, H, W, s, g)
    return _grid_sample_border(x, grid_n, s, g)                      # NHWC upsampled


# --------------------------- UpDysample forward ------------------------------

def up_dysample_forward(x, params, *, scale, groups, eps=1e-5):
    x_up = _dysample_lp(x, params["w_off"], params["b_off"],
                        params["init_pos"], scale, groups)
    return _conv3x3_bn_relu(x_up, params["w_conv"], params["gamma"],
                            params["beta"], eps=eps)


def init_params(key, in_ch, out_ch, scale, groups):
    C_off = 2 * groups * scale * scale
    k1, k2 = jax.random.split(key, 2)
    # DySample offset conv: normal_init(std=0.001), bias = 0
    w_off = 0.001 * jax.random.normal(k1, (C_off, in_ch), jnp.float32)
    b_off = jnp.zeros((C_off,), jnp.float32)
    # init_pos buffer (matches DySample._init_pos flattening order)
    h = (jnp.arange(scale, dtype=jnp.float32) - (scale - 1) / 2.0) / scale
    ip_x = jnp.broadcast_to(h[None, :], (scale, scale))
    ip_y = jnp.broadcast_to(h[:, None], (scale, scale))
    ip = jnp.stack([ip_x, ip_y], axis=0).reshape(2, scale * scale)
    init_pos = jnp.tile(ip[:, None, :], (1, groups, 1)).reshape(-1)  # (C_off,)
    # 3x3 conv (bias=False) + BatchNorm (PyTorch default affine init)
    w_conv = 0.05 * jax.random.normal(k2, (out_ch, in_ch, 3, 3), jnp.float32)
    gamma = jnp.ones((out_ch,), jnp.float32)
    beta = jnp.zeros((out_ch,), jnp.float32)
    return dict(w_off=w_off, b_off=b_off, init_pos=init_pos,
                w_conv=w_conv, gamma=gamma, beta=beta)


# --------------------------- plain-JAX reference ------------------------------

def _reference_forward(x, params, *, scale, groups, eps=1e-5):
    # f32 XLA reference of the PyTorch training-mode forward.
    # TODO(synk): BatchNorm running statistics are not tracked (inference state not needed here).
    off = (jnp.einsum('bchw,kc->bkhw', x, params["w_off"])
           + params["b_off"][None, :, None, None])
    off = off * 0.25 + params["init_pos"][None, :, None, None]
    B, C, H, W = x.shape
    grid_n = _build_sample_grid(off, H, W, scale, groups)
    x_up = _grid_sample_border(x, grid_n, scale, groups)             # NHWC
    z = jax.lax.conv_general_dilated(
        jnp.transpose(x_up, (0, 3, 1, 2)), params["w_conv"],
        window_strides=(1, 1), padding=((1, 1), (1, 1)),
        dimension_numbers=("NCHW", "OIHW", "NCHW"))
    mean = jnp.mean(z, axis=(0, 2, 3), keepdims=True)
    var = jnp.mean((z - mean) ** 2, axis=(0, 2, 3), keepdims=True)
    zn = (z - mean) * jax.lax.rsqrt(var + eps)
    y = zn * params["gamma"][None, :, None, None] + params["beta"][None, :, None, None]
    return jnp.maximum(y, 0.0)


if __name__ == "__main__":
    key = jax.random.PRNGKey(0)
    B, in_ch, H, W = 2, 8, 16, 16
    out_ch, scale, groups = 8, 2, 4

    kx, kp = jax.random.split(key)
    x = jax.random.normal(kx, (B, in_ch, H, W), jnp.float32)
    params = init_params(kp, in_ch, out_ch, scale, groups)

    fwd = jax.jit(functools.partial(up_dysample_forward, scale=scale, groups=groups))
    y = jax.block_until_ready(fwd(x, params))

    assert y.shape == (B, out_ch, scale * H, scale * W)
    assert bool(jnp.all(jnp.isfinite(y))) and bool(jnp.all(y >= 0.0))

    y_ref = _reference_forward(x, params, scale=scale, groups=groups)
    err = float(jnp.max(jnp.abs(y - y_ref)))
    assert err < 1e-1, f"max abs err vs reference: {err}"
    print("KERNEL_OK")
</pallas_src>

<mosaic_0001>
module attributes {stable_mosaic.version = 11 : i64} {
  func.func @_offset_conv_kernel(%arg0: i32, %arg1: memref<512x8xbf16, #tpu.memory_space<vmem>>, %arg2: memref<8x32xbf16, #tpu.memory_space<vmem>>, %arg3: memref<1x32xf32, #tpu.memory_space<vmem>>, %arg4: memref<512x32xf32, #tpu.memory_space<vmem>>) attributes {dimension_semantics = [#tpu.dimension_semantics<parallel>], iteration_bounds = array<i64: 1>, scalar_prefetch = 0 : i64, scratch_operands = 0 : i64, tpu.core_type = #tpu.core_type<tc>, window_params = [{transform_indices = @transform_0, window_bounds = array<i64: 512, 8>}, {pipeline_mode = #tpu.pipeline_mode<synchronous>, transform_indices = @transform_1, window_bounds = array<i64: 8, 32>}, {pipeline_mode = #tpu.pipeline_mode<synchronous>, transform_indices = @transform_2, window_bounds = array<i64: 1, 32>}, {transform_indices = @transform_3, window_bounds = array<i64: 512, 32>}]} {
    %c0 = arith.constant 0 : index
    %c0_0 = arith.constant 0 : index
    %0 = vector.load %arg1[%c0, %c0_0] : memref<512x8xbf16, #tpu.memory_space<vmem>>, vector<512x8xbf16>
    %c0_1 = arith.constant 0 : index
    %c0_2 = arith.constant 0 : index
    %1 = vector.load %arg2[%c0_1, %c0_2] : memref<8x32xbf16, #tpu.memory_space<vmem>>, vector<8x32xbf16>
    %cst = arith.constant dense<0.000000e+00> : vector<512x32xf32>
    %2 = tpu.matmul %0, %1, %cst {dimension_numbers = #tpu.dot_dimension_numbers<[1], [0], [0], [1], [0, 0, 1, 1], [], []>} : vector<512x8xbf16>, vector<8x32xbf16>, vector<512x32xf32> -> vector<512x32xf32>
    %c0_3 = arith.constant 0 : index
    %c0_4 = arith.constant 0 : index
    %3 = vector.load %arg3[%c0_3, %c0_4] : memref<1x32xf32, #tpu.memory_space<vmem>>, vector<1x32xf32>
    %4 = vector.broadcast %3 : vector<1x32xf32> to vector<512x32xf32>
    %5 = arith.addf %2, %4 : vector<512x32xf32>
    %c0_5 = arith.constant 0 : index
    %c0_6 = arith.constant 0 : index
    %6 = vector.load %arg4[%c0_5, %c0_6] : memref<512x32xf32, #tpu.memory_space<vmem>>, vector<512x32xf32>
    tpu.vector_store %arg4[%c0_5, %c0_6], %5 {strides = array<i32>} : memref<512x32xf32, #tpu.memory_space<vmem>>, vector<512x32xf32>,
    return
  }
  func.func @transform_0(%arg0: i32) -> (i32, i32) {
    %c0_i32 = arith.constant 0 : i32
    %c0_i32_0 = arith.constant 0 : i32
    return %arg0, %c0_i32 : i32, i32
  }
  func.func @transform_1(%arg0: i32) -> (i32, i32) {
    %c0_i32 = arith.constant 0 : i32
    %c0_i32_0 = arith.constant 0 : i32
    %c0_i32_1 = arith.constant 0 : i32
    return %c0_i32, %c0_i32_0 : i32, i32
  }
  func.func @transform_2(%arg0: i32) -> (i32, i32) {
    %c0_i32 = arith.constant 0 : i32
    %c0_i32_0 = arith.constant 0 : i32
    %c0_i32_1 = arith.constant 0 : i32
    return %c0_i32, %c0_i32_0 : i32, i32
  }
  func.func @transform_3(%arg0: i32) -> (i32, i32) {
    %c0_i32 = arith.constant 0 : i32
    %c0_i32_0 = arith.constant 0 : i32
    return %arg0, %c0_i32 : i32, i32
  }
}

module attributes {stable_mosaic.version = 11 : i64} {
  func.func @_conv_stats_kernel(%arg0: i32, %arg1: i32, %arg2: memref<1x1x34x272xbf16, #tpu.memory_space<vmem>>, %arg3: memref<3x272x256xbf16, #tpu.memory_space<vmem>>, %arg4: memref<1x2x256xf32, #tpu.memory_space<vmem>>) attributes {dimension_semantics = [#tpu.dimension_semantics<parallel>, #tpu.dimension_semantics<arbitrary>], iteration_bounds = array<i64: 2, 1>, scalar_prefetch = 0 : i64, scratch_operands = 0 : i64, tpu.core_type = #tpu.core_type<tc>, window_params = [{transform_indices = @transform_0, window_bounds = array<i64: 1, 1, 34, 272>}, {pipeline_mode = #tpu.pipeline_mode<synchronous>, transform_indices = @transform_1, window_bounds = array<i64: 3, 272, 256>}, {transform_indices = @transform_2, window_bounds = array<i64: 1, 2, 256>}]} {
    %c0_i32 = arith.constant 0 : i32
    %0 = arith.cmpi eq, %arg1, %c0_i32 : i32
    %1 = arith.extui %0 : i1 to i32
    %c0_i32_0 = arith.constant 0 : i32
    %2 = arith.cmpi ne, %1, %c0_i32_0 : i32
    scf.if %2 {
      %cst_32 = arith.constant 0.000000e+00 : f32
      %44 = vector.broadcast %cst_32 : f32 to vector<1x2x256xf32>
      %c0_33 = arith.constant 0 : index
      %c0_34 = arith.constant 0 : index
      %c0_35 = arith.constant 0 : index
      %45 = vector.load %arg4[%c0_33, %c0_34, %c0_35] : memref<1x2x256xf32, #tpu.memory_space<vmem>>, vector<1x2x256xf32>
      tpu.vector_store %arg4[%c0_33, %c0_34, %c0_35], %44 {strides = array<i32>} : memref<1x2x256xf32, #tpu.memory_space<vmem>>, vector<1x2x256xf32>,
    } else {
    }
    %cst = arith.constant 0.000000e+00 : f32
    %3 = vector.broadcast %cst : f32 to vector<32x256xf32>
    %c0 = arith.constant 0 : index
    %c0_1 = arith.constant 0 : index
    %c0_2 = arith.constant 0 : index
    %c0_3 = arith.constant 0 : index
    %4 = vector.load %arg2[%c0, %c0_1, %c0_2, %c0_3] : memref<1x1x34x272xbf16, #tpu.memory_space<vmem>>, vector<1x1x32x272xbf16>
    %5 = vector.shape_cast %4 : vector<1x1x32x272xbf16> to vector<32x272xbf16>
    %c0_4 = arith.constant 0 : index
    %c0_5 = arith.constant 0 : index
    %c0_6 = arith.constant 0 : index
    %6 = vector.load %arg3[%c0_4, %c0_5, %c0_6] : memref<3x272x256xbf16, #tpu.memory_space<vmem>>, vector<1x272x256xbf16>
    %7 = vector.shape_cast %6 : vector<1x272x256xbf16> to vector<272x256xbf16>
    %cst_7 = arith.constant dense<0.000000e+00> : vector<32x256xf32>
    %8 = tpu.matmul %5, %7, %cst_7 {dimension_numbers = #tpu.dot_dimension_numbers<[1], [0], [0], [1], [0, 0, 1, 1], [], []>} : vector<32x272xbf16>, vector<272x256xbf16>, vector<32x256xf32> -> vector<32x256xf32>
    %9 = arith.addf %3, %8 : vector<32x256xf32>
    %c0_8 = arith.constant 0 : index
    %c0_9 = arith.constant 0 : index
    %c1 = arith.constant 1 : index
    %c0_10 = arith.constant 0 : index
    %10 = vector.load %arg2[%c0_8, %c0_9, %c1, %c0_10] : memref<1x1x34x272xbf16, #tpu.memory_space<vmem>>, vector<1x1x32x272xbf16>
    %11 = vector.shape_cast %10 : vector<1x1x32x272xbf16> to vector<32x272xbf16>
    %c1_11 = arith.constant 1 : index
    %c0_12 = arith.constant 0 : index
    %c0_13 = arith.constant 0 : index
    %12 = vector.load %arg3[%c1_11, %c0_12, %c0_13] : memref<3x272x256xbf16, #tpu.memory_space<vmem>>, vector<1x272x256xbf16>
    %13 = vector.shape_cast %12 : vector<1x272x256xbf16> to vector<272x256xbf16>
    %cst_14 = arith.constant dense<0.000000e+00> : vector<32x256xf32>
    %14 = tpu.matmul %11, %13, %cst_14 {dimension_numbers = #tpu.dot_dimension_numbers<[1], [0], [0], [1], [0, 0, 1, 1], [], []>} : vector<32x272xbf16>, vector<272x256xbf16>, vector<32x256xf32> -> vector<32x256xf32>
    %15 = arith.addf %9, %14 : vector<32x256xf32>
    %c0_15 = arith.constant 0 : index
    %c0_16 = arith.constant 0 : index
    %c2 = arith.constant 2 : index
    %c0_17 = arith.constant 0 : index
    %16 = vector.load %arg2[%c0_15, %c0_16, %c2, %c0_17] : memref<1x1x34x272xbf16, #tpu.memory_space<vmem>>, vector<1x1x32x272xbf16>
    %17 = vector.shape_cast %16 : vector<1x1x32x272xbf16> to vector<32x272xbf16>
    %c2_18 = arith.constant 2 : index
    %c0_19 = arith.constant 0 : index
    %c0_20 = arith.constant 0 : index
    %18 = vector.load %arg3[%c2_18, %c0_19, %c0_20] : memref<3x272x256xbf16, #tpu.memory_space<vmem>>, vector<1x272x256xbf16>
    %19 = vector.shape_cast %18 : vector<1x272x256xbf16> to vector<272x256xbf16>
    %cst_21 = arith.constant dense<0.000000e+00> : vector<32x256xf32>
    %20 = tpu.matmul %17, %19, %cst_21 {dimension_numbers = #tpu.dot_dimension_numbers<[1], [0], [0], [1], [0, 0, 1, 1], [], []>} : vector<32x272xbf16>, vector<272x256xbf16>, vector<32x256xf32> -> vector<32x256xf32>
    %21 = arith.addf %15, %20 : vector<32x256xf32>
    %22 = tpu.iota {dimensions = array<i32: 0>} : vector<32x1xi32>
    %c32_i32 = arith.constant 32 : i32
    %23 = arith.muli %arg1, %c32_i32 : i32
    %24 = vector.broadcast %23 : i32 to vector<32x1xi32>
    %25 = arith.addi %22, %24 : vector<32x1xi32>
    %c32_i32_22 = arith.constant 32 : i32
    %26 = vector.broadcast %c32_i32_22 : i32 to vector<32x1xi32>
    %27 = arith.cmpi slt, %25, %26 : vector<32x1xi32>
    %cst_23 = arith.constant 0.000000e+00 : f32
    %28 = vector.shape_cast %27 : vector<32x1xi1> to vector<32x1xi1>
    %29 = vector.broadcast %28 : vector<32x1xi1> to vector<32x256xi1>
    %30 = vector.broadcast %cst_23 : f32 to vector<32x256xf32>
    %31 = arith.select %29, %21, %30 : vector<32x256xi1>, vector<32x256xf32>
    %cst_24 = arith.constant dense<0.000000e+00> : vector<256xf32>
    %32 = vector.multi_reduction <add>, %31, %cst_24 [0] : vector<32x256xf32> to vector<256xf32>
    %33 = vector.shape_cast %32 : vector<256xf32> to vector<1x256xf32>
    %34 = arith.mulf %31, %31 : vector<32x256xf32>
    %cst_25 = arith.constant dense<0.000000e+00> : vector<256xf32>
    %35 = vector.multi_reduction <add>, %34, %cst_25 [0] : vector<32x256xf32> to vector<256xf32>
    %36 = vector.shape_cast %35 : vector<256xf32> to vector<1x256xf32>
    %37 = tpu.concatenate %33, %36 in 0 : vector<1x256xf32>, vector<1x256xf32> -> vector<2x256xf32>
    %c0_26 = arith.constant 0 : index
    %c0_27 = arith.constant 0 : index
    %c0_28 = arith.constant 0 : index
    %38 = vector.load %arg4[%c0_26, %c0_27, %c0_28] : memref<1x2x256xf32, #tpu.memory_space<vmem>>, vector<1x2x256xf32>
    %39 = vector.shape_cast %38 : vector<1x2x256xf32> to vector<2x256xf32>
    %40 = arith.addf %39, %37 : vector<2x256xf32>
    %c0_29 = arith.constant 0 : index
    %c0_30 = arith.constant 0 : index
    %c0_31 = arith.constant 0 : index
    %41 = vector.load %arg4[%c0_29, %c0_30, %c0_31] : memref<1x2x256xf32, #tpu.memory_space<vmem>>, vector<1x2x256xf32>
    %42 = vector.shape_cast %41 : vector<1x2x256xf32> to vector<2x256xf32>
    %43 = vector.shape_cast %40 : vector<2x256xf32> to vector<1x2x256xf32>
    tpu.vector_store %arg4[%c0_29, %c0_30, %c0_31], %43 {strides = array<i32>} : memref<1x2x256xf32, #tpu.memory_space<vmem>>, vector<1x2x256xf32>,
    return
  }
  func.func @transform_0(%arg0: i32, %arg1: i32) -> (i32, i32, i32, i32) {
    %c0_i32 = arith.constant 0 : i32
    %c0_i32_0 = arith.constant 0 : i32
    %c0_i32_1 = arith.constant 0 : i32
    return %arg0, %arg1, %c0_i32, %c0_i32_0 : i32, i32, i32, i32
  }
  func.func @transform_1(%arg0: i32, %arg1: i32) -> (i32, i32, i32) {
    %c0_i32 = arith.constant 0 : i32
    %c0_i32_0 = arith.constant 0 : i32
    %c0_i32_1 = arith.constant 0 : i32
    %c0_i32_2 = arith.constant 0 : i32
    return %c0_i32, %c0_i32_0, %c0_i32_1 : i32, i32, i32
  }
  func.func @transform_2(%arg0: i32, %arg1: i32) -> (i32, i32, i32) {
    %c0_i32 = arith.constant 0 : i32
    %c0_i32_0 = arith.constant 0 : i32
    %c0_i32_1 = arith.constant 0 : i32
    return %arg0, %c0_i32, %c0_i32_0 : i32, i32, i32
  }
}

module attributes {stable_mosaic.version = 11 : i64} {
  func.func @_conv_bn_relu_kernel(%arg0: i32, %arg1: i32, %arg2: memref<1x1x34x272xbf16, #tpu.memory_space<vmem>>, %arg3: memref<3x272x256xbf16, #tpu.memory_space<vmem>>, %arg4: memref<1x256xf32, #tpu.memory_space<vmem>>, %arg5: memref<1x256xf32, #tpu.memory_space<vmem>>, %arg6: memref<1x32x256xf32, #tpu.memory_space<vmem>>) attributes {dimension_semantics = [#tpu.dimension_semantics<parallel>, #tpu.dimension_semantics<parallel>], iteration_bounds = array<i64: 2, 1>, scalar_prefetch = 0 : i64, scratch_operands = 0 : i64, tpu.core_type = #tpu.core_type<tc>, window_params = [{transform_indices = @transform_0, window_bounds = array<i64: 1, 1, 34, 272>}, {pipeline_mode = #tpu.pipeline_mode<synchronous>, transform_indices = @transform_1, window_bounds = array<i64: 3, 272, 256>}, {pipeline_mode = #tpu.pipeline_mode<synchronous>, transform_indices = @transform_2, window_bounds = array<i64: 1, 256>}, {pipeline_mode = #tpu.pipeline_mode<synchronous>, transform_indices = @transform_3, window_bounds = array<i64: 1, 256>}, {transform_indices = @transform_4, window_bounds = array<i64: 1, 32, 256>}]} {
    %cst = arith.constant 0.000000e+00 : f32
    %0 = vector.broadcast %cst : f32 to vector<32x256xf32>
    %c0 = arith.constant 0 : index
    %c0_0 = arith.constant 0 : index
    %c0_1 = arith.constant 0 : index
    %c0_2 = arith.constant 0 : index
    %1 = vector.load %arg2[%c0, %c0_0, %c0_1, %c0_2] : memref<1x1x34x272xbf16, #tpu.memory_space<vmem>>, vector<1x1x32x272xbf16>
    %2 = vector.shape_cast %1 : vector<1x1x32x272xbf16> to vector<32x272xbf16>
    %c0_3 = arith.constant 0 : index
    %c0_4 = arith.constant 0 : index
    %c0_5 = arith.constant 0 : index
    %3 = vector.load %arg3[%c0_3, %c0_4, %c0_5] : memref<3x272x256xbf16, #tpu.memory_space<vmem>>, vector<1x272x256xbf16>
    %4 = vector.shape_cast %3 : vector<1x272x256xbf16> to vector<272x256xbf16>
    %cst_6 = arith.constant dense<0.000000e+00> : vector<32x256xf32>
    %5 = tpu.matmul %2, %4, %cst_6 {dimension_numbers = #tpu.dot_dimension_numbers<[1], [0], [0], [1], [0, 0, 1, 1], [], []>} : vector<32x272xbf16>, vector<272x256xbf16>, vector<32x256xf32> -> vector<32x256xf32>
    %6 = arith.addf %0, %5 : vector<32x256xf32>
    %c0_7 = arith.constant 0 : index
    %c0_8 = arith.constant 0 : index
    %c1 = arith.constant 1 : index
    %c0_9 = arith.constant 0 : index
    %7 = vector.load %arg2[%c0_7, %c0_8, %c1, %c0_9] : memref<1x1x34x272xbf16, #tpu.memory_space<vmem>>, vector<1x1x32x272xbf16>
    %8 = vector.shape_cast %7 : vector<1x1x32x272xbf16> to vector<32x272xbf16>
    %c1_10 = arith.constant 1 : index
    %c0_11 = arith.constant 0 : index
    %c0_12 = arith.constant 0 : index
    %9 = vector.load %arg3[%c1_10, %c0_11, %c0_12] : memref<3x272x256xbf16, #tpu.memory_space<vmem>>, vector<1x272x256xbf16>
    %10 = vector.shape_cast %9 : vector<1x272x256xbf16> to vector<272x256xbf16>
    %cst_13 = arith.constant dense<0.000000e+00> : vector<32x256xf32>
    %11 = tpu.matmul %8, %10, %cst_13 {dimension_numbers = #tpu.dot_dimension_numbers<[1], [0], [0], [1], [0, 0, 1, 1], [], []>} : vector<32x272xbf16>, vector<272x256xbf16>, vector<32x256xf32> -> vector<32x256xf32>
    %12 = arith.addf %6, %11 : vector<32x256xf32>
    %c0_14 = arith.constant 0 : index
    %c0_15 = arith.constant 0 : index
    %c2 = arith.constant 2 : index
    %c0_16 = arith.constant 0 : index
    %13 = vector.load %arg2[%c0_14, %c0_15, %c2, %c0_16] : memref<1x1x34x272xbf16, #tpu.memory_space<vmem>>, vector<1x1x32x272xbf16>
    %14 = vector.shape_cast %13 : vector<1x1x32x272xbf16> to vector<32x272xbf16>
    %c2_17 = arith.constant 2 : index
    %c0_18 = arith.constant 0 : index
    %c0_19 = arith.constant 0 : index
    %15 = vector.load %arg3[%c2_17, %c0_18, %c0_19] : memref<3x272x256xbf16, #tpu.memory_space<vmem>>, vector<1x272x256xbf16>
    %16 = vector.shape_cast %15 : vector<1x272x256xbf16> to vector<272x256xbf16>
    %cst_20 = arith.constant dense<0.000000e+00> : vector<32x256xf32>
    %17 = tpu.matmul %14, %16, %cst_20 {dimension_numbers = #tpu.dot_dimension_numbers<[1], [0], [0], [1], [0, 0, 1, 1], [], []>} : vector<32x272xbf16>, vector<272x256xbf16>, vector<32x256xf32> -> vector<32x256xf32>
    %18 = arith.addf %12, %17 : vector<32x256xf32>
    %c0_21 = arith.constant 0 : index
    %c0_22 = arith.constant 0 : index
    %19 = vector.load %arg4[%c0_21, %c0_22] : memref<1x256xf32, #tpu.memory_space<vmem>>, vector<1x256xf32>
    %20 = vector.broadcast %19 : vector<1x256xf32> to vector<32x256xf32>
    %21 = arith.mulf %18, %20 : vector<32x256xf32>
    %c0_23 = arith.constant 0 : index
    %c0_24 = arith.constant 0 : index
    %22 = vector.load %arg5[%c0_23, %c0_24] : memref<1x256xf32, #tpu.memory_space<vmem>>, vector<1x256xf32>
    %23 = vector.broadcast %22 : vector<1x256xf32> to vector<32x256xf32>
    %24 = arith.addf %21, %23 : vector<32x256xf32>
    %cst_25 = arith.constant 0.000000e+00 : f32
    %25 = vector.broadcast %cst_25 : f32 to vector<32x256xf32>
    %26 = arith.maximumf %24, %25 : vector<32x256xf32>
    %c0_26 = arith.constant 0 : index
    %c0_27 = arith.constant 0 : index
    %c0_28 = arith.constant 0 : index
    %27 = vector.load %arg6[%c0_26, %c0_27, %c0_28] : memref<1x32x256xf32, #tpu.memory_space<vmem>>, vector<1x32x256xf32>
    %28 = vector.shape_cast %27 : vector<1x32x256xf32> to vector<32x256xf32>
    %29 = vector.shape_cast %26 : vector<32x256xf32> to vector<1x32x256xf32>
    tpu.vector_store %arg6[%c0_26, %c0_27, %c0_28], %29 {strides = array<i32>} : memref<1x32x256xf32, #tpu.memory_space<vmem>>, vector<1x32x256xf32>,
    return
  }
  func.func @transform_0(%arg0: i32, %arg1: i32) -> (i32, i32, i32, i32) {
    %c0_i32 = arith.constant 0 : i32
    %c0_i32_0 = arith.constant 0 : i32
    %c0_i32_1 = arith.constant 0 : i32
    return %arg0, %arg1, %c0_i32, %c0_i32_0 : i32, i32, i32, i32
  }
  func.func @transform_1(%arg0: i32, %arg1: i32) -> (i32, i32, i32) {
    %c0_i32 = arith.constant 0 : i32
    %c0_i32_0 = arith.constant 0 : i32
    %c0_i32_1 = arith.constant 0 : i32
    %c0_i32_2 = arith.constant 0 : i32
    return %c0_i32, %c0_i32_0, %c0_i32_1 : i32, i32, i32
  }
  func.func @transform_2(%arg0: i32, %arg1: i32) -> (i32, i32) {
    %c0_i32 = arith.constant 0 : i32
    %c0_i32_0 = arith.constant 0 : i32
    %c0_i32_1 = arith.constant 0 : i32
    return %c0_i32, %c0_i32_0 : i32, i32
  }
  func.func @transform_3(%arg0: i32, %arg1: i32) -> (i32, i32) {
    %c0_i32 = arith.constant 0 : i32
    %c0_i32_0 = arith.constant 0 : i32
    %c0_i32_1 = arith.constant 0 : i32
    return %c0_i32, %c0_i32_0 : i32, i32
  }
  func.func @transform_4(%arg0: i32, %arg1: i32) -> (i32, i32, i32) {
    %c0_i32 = arith.constant 0 : i32
    %c0_i32_0 = arith.constant 0 : i32
    return %arg0, %arg1, %c0_i32 : i32, i32, i32
  }
}

</mosaic_0001>

<bundles_post_ra>
// kernel: up_dysample_forward.3
= control target key start
LH: loop header
LB: loop body
LE: loop exit
PB: predicated region body
PF: predicated region fallthrough
CT: control target
= control target key end

     0   :  { %vm344_vm0 = vcmask 1043456   ;;  %vm247_vm1 = vcmask 64512   ;;  %vm637_vm2 = vcmask 261120   ;;  %s1382_s1 = inlined_call_operand.vmem [shape: bf16[8,32], index: 1, kind: input, shape index: {}]   ;;  %s1383_s0 = inlined_call_operand.vmem [shape: bf16[512,8], index: 0, kind: input, shape index: {}]   ;;  %s1384_s2 = inlined_call_operand.vmem [shape: f32[1,32], index: 2, kind: input, shape index: {}]   ;;  %s1385_s3 = inlined_call_operand.vmem [shape: f32[512,32], index: 3, kind: output, shape index: {}]  }
   0x1   :  { %v79_v0 = vld [vmem:[%s1382_s1] sm:$0xf]  ;;  %v876_v4 = vld [vmem:[%s1383_s0 + $0x8] sm:$0xff]   ;;  %v878_v6 = vld [vmem:[%s1383_s0 + $0x10] sm:$0xff]  }
   0x2   :  { %872 = vmatprep.subr.msk.bf16.mxu0 %vm344_vm0, %v79_v0  ;;  %873 = vmatprep.subr.msk.bf16.mxu1 %vm344_vm0, %v79_v0  ;;  %v346_v1 = vsel %vm344_vm0, %v79_v0, 0  ;;  %v874_v2 = vld [vmem:[%s1383_s0] sm:$0xff]   ;;  %v877_v5 = vld [vmem:[%s1383_s0 + $0x88] sm:$0xff]   ;;  %v879_v7 = vld [vmem:[%s1383_s0 + $0x90] sm:$0xff]  }
   0x3   :  { %805 = vmatpush3.bf16.msra.mxu0 %v346_v1  ;;  %871 = vmatpush3.bf16.msra.mxu1 %v346_v1  ;;  %v875_v3 = vld [vmem:[%s1383_s0 + $0x80] sm:$0xff]   ;;  %v880_v8 = vld [vmem:[%s1383_s0 + $0x18] sm:$0xff]   ;;  %v884_v12 = vld [vmem:[%s1383_s0 + $0x28] sm:$0xff]  }
   0x4   :  { %806 = vmatprep.mubr.msk.bf16.mxu0 %vm247_vm1, %v874_v2  ;;  %838 = vmatprep.mubr.msk.bf16.mxu1 %vm247_vm1, %v875_v3  ;;  %v881_v9 = vld [vmem:[%s1383_s0 + $0x98] sm:$0xff]   ;;  %v882_v10 = vld [vmem:[%s1383_s0 + $0x20] sm:$0xff]   ;;  %v885_v13 = vld [vmem:[%s1383_s0 + $0xa8] sm:$0xff]  }
   0x5   :  { %v883_v11 = vld [vmem:[%s1383_s0 + $0xa0] sm:$0xff]   ;;  %v886_v14 = vld [vmem:[%s1383_s0 + $0x30] sm:$0xff]   ;;  %v888_v16 = vld [vmem:[%s1383_s0 + $0x38] sm:$0xff]  }
   0x6   :  { %807 = vmatmul.mubr.msk.bf16.vlgmr.msra.gmra.mrb[0].mxu0 %vm247_vm1, %v876_v4  ;;  %839 = vmatmul.mubr.msk.bf16.vlgmr.msra.gmra.mrb[0].mxu1 %vm247_vm1, %v877_v5  ;;  %v887_v15 = vld [vmem:[%s1383_s0 + $0xb0] sm:$0xff]   ;;  %v889_v17 = vld [vmem:[%s1383_s0 + $0xb8] sm:$0xff]   ;;  %v890_v18 = vld [vmem:[%s1383_s0 + $0x40] sm:$0xff]  }
   0x7   :  { %810 = vmatprep.mubr.msk.bf16.mxu0 %vm247_vm1, %v878_v6  ;;  %842 = vmatprep.mubr.msk.bf16.mxu1 %vm247_vm1, %v879_v7  ;;  %v891_v19 = vld [vmem:[%s1383_s0 + $0xc0] sm:$0xff]   ;;  %v892_v20 = vld [vmem:[%s1383_s0 + $0x48] sm:$0xff]   ;;  %v894_v22 = vld [vmem:[%s1383_s0 + $0x50] sm:$0xff]  }
   0x8   :  { %v893_v21 = vld [vmem:[%s1383_s0 + $0xc8] sm:$0xff]   ;;  %v895_v23 = vld [vmem:[%s1383_s0 + $0xd0] sm:$0xff]   ;;  %v896_v24 = vld [vmem:[%s1383_s0 + $0x58] sm:$0xff]  }
   0x9   :  { %v897_v25 = vld [vmem:[%s1383_s0 + $0xd8] sm:$0xff]   ;;  %v898_v26 = vld [vmem:[%s1383_s0 + $0x60] sm:$0xff]   ;;  %v900_v28 = vld [vmem:[%s1383_s0 + $0x68] sm:$0xff]  }
   0xa   :  { %v899_v27 = vld [vmem:[%s1383_s0 + $0xe0] sm:$0xff]   ;;  %v901_v29 = vld [vmem:[%s1383_s0 + $0xe8] sm:$0xff]   ;;  %v902_v30 = vld [vmem:[%s1383_s0 + $0x70] sm:$0xff]  }
   0xb   :  { %v903_v31 = vld [vmem:[%s1383_s0 + $0xf0] sm:$0xff]   ;;  %v904_v32 = vld [vmem:[%s1383_s0 + $0x78] sm:$0xff]   ;;  %v1060_v34 = vld [vmem:[%s1384_s2] ss:$0 sm:$0xff] }
   0xc   :  { %v905_v33 = vld [vmem:[%s1383_s0 + $0xf8] sm:$0xff]  }
   0xe   :  { %811 = vmatmul.mubr.msk.bf16.gmra.mrb[4].mxu0 %vm247_vm1, %v880_v8  ;;  %843 = vmatmul.mubr.msk.bf16.gmra.mrb[4].mxu1 %vm247_vm1, %v881_v9 }
   0xf   :  { %814 = vmatprep.mubr.msk.bf16.mxu0 %vm247_vm1, %v882_v10  ;;  %846 = vmatprep.mubr.msk.bf16.mxu1 %vm247_vm1, %v883_v11 }
  0x16   :  { %815 = vmatmul.mubr.msk.bf16.gmra.mrb[8].mxu0 %vm247_vm1, %v884_v12  ;;  %847 = vmatmul.mubr.msk.bf16.gmra.mrb[8].mxu1 %vm247_vm1, %v885_v13 }
  0x17   :  { %818 = vmatprep.mubr.msk.bf16.mxu0 %vm247_vm1, %v886_v14  ;;  %850 = vmatprep.mubr.msk.bf16.mxu1 %vm247_vm1, %v887_v15 }
  0x1e   :  { %819 = vmatmul.mubr.msk.bf16.gmra.mrb[12].mxu0 %vm247_vm1, %v888_v16  ;;  %851 = vmatmul.mubr.msk.bf16.gmra.mrb[12].mxu1 %vm247_vm1, %v889_v17 }
  0x1f   :  { %822 = vmatprep.mubr.msk.bf16.mxu0 %vm247_vm1, %v890_v18  ;;  %854 = vmatprep.mubr.msk.bf16.mxu1 %vm247_vm1, %v891_v19 }
  0x26   :  { %823 = vmatmul.mubr.msk.bf16.gmra.mrb[16].mxu0 %vm247_vm1, %v892_v20  ;;  %855 = vmatmul.mubr.msk.bf16.gmra.mrb[16].mxu1 %vm247_vm1, %v893_v21 }
  0x27   :  { %826 = vmatprep.mubr.msk.bf16.mxu0 %vm247_vm1, %v894_v22  ;;  %858 = vmatprep.mubr.msk.bf16.mxu1 %vm247_vm1, %v895_v23 }
  0x2e   :  { %827 = vmatmul.mubr.msk.bf16.gmra.mrb[20].mxu0 %vm247_vm1, %v896_v24  ;;  %859 = vmatmul.mubr.msk.bf16.gmra.mrb[20].mxu1 %vm247_vm1, %v897_v25 }
  0x2f   :  { %830 = vmatprep.mubr.msk.bf16.mxu0 %vm247_vm1, %v898_v26  ;;  %862 = vmatprep.mubr.msk.bf16.mxu1 %vm247_vm1, %v899_v27 }
  0x36   :  { %831 = vmatmul.mubr.msk.bf16.gmra.mrb[24].mxu0 %vm247_vm1, %v900_v28  ;;  %863 = vmatmul.mubr.msk.bf16.gmra.mrb[24].mxu1 %vm247_vm1, %v901_v29 }
  0x37   :  { %834 = vmatprep.mubr.msk.bf16.mxu0 %vm247_vm1, %v902_v30  ;;  %866 = vmatprep.mubr.msk.bf16.mxu1 %vm247_vm1, %v903_v31 }
  0x3e   :  { %835 = vmatmul.mubr.msk.bf16.gmra.mrb[28].mxu0 %vm247_vm1, %v904_v32  ;;  %867 = vmatmul.mubr.msk.bf16.gmra.mrb[28].mxu1 %vm247_vm1, %v905_v33 }
  0xd9   :  { %v808_v35 = vpop.f32.mrb[0].mxu0  ;;  %v840_v37 = vpop.f32.mrb[0].mxu1 }
  0xda   :  { %v391_v36 = vadd.f32 %v808_v35, %v1060_v34  ;;  %v382_v38 = vpop.f32.mrb[1].mxu0  ;;  %v519_v39 = vadd.f32 %v840_v37, %v1060_v34  ;;  %v510_v41 = vpop.f32.mrb[1].mxu1 }
  0xdb   :  { %v383_v40 = vadd.f32 %v1060_v34, %v382_v38  ;;  %v809_v42 = vpop.f32.mrb[2].mxu0  ;;  %v511_v43 = vadd.f32 %v1060_v34, %v510_v41  ;;  %v841_v45 = vpop.f32.mrb[2].mxu1 }
  0xdc   :  { %640 = vst.msk [vmem:[%s1385_s3 + $0x10] sm:$0xff] %vm637_vm2, %v391_v36  ;;  %v394_v44 = vadd.f32 %v809_v42, %v1060_v34  ;;  %v385_v46 = vpop.f32.mrb[3].mxu0  ;;  %672 = vst.msk [vmem:[%s1385_s3 + $0x110] sm:$0xff] %vm637_vm2, %v519_v39  ;;  %v522_v47 = vadd.f32 %v841_v45, %v1060_v34  ;;  %v513_v49 = vpop.f32.mrb[3].mxu1 }
  0xdd   :  { %638 = vst.msk [vmem:[%s1385_s3] sm:$0xff] %vm637_vm2, %v383_v40  ;;  %v386_v48 = vadd.f32 %v1060_v34, %v385_v46  ;;  %670 = vst.msk [vmem:[%s1385_s3 + $0x100] sm:$0xff] %vm637_vm2, %v511_v43  ;;  %v514_v50 = vadd.f32 %v1060_v34, %v513_v49 }
  0xde   :  { %641 = vst.msk [vmem:[%s1385_s3 + $0x18] sm:$0xff] %vm637_vm2, %v394_v44  ;;  %673 = vst.msk [vmem:[%s1385_s3 + $0x118] sm:$0xff] %vm637_vm2, %v522_v47 }
  0xdf   :  { %639 = vst.msk [vmem:[%s1385_s3 + $0x8] sm:$0xff] %vm637_vm2, %v386_v48  ;;  %671 = vst.msk [vmem:[%s1385_s3 + $0x108] sm:$0xff] %vm637_vm2, %v514_v50 }
  0xe1   :  { %v812_v51 = vpop.f32.mrb[4].mxu0  ;;  %v844_v53 = vpop.f32.mrb[4].mxu1 }
  0xe2   :  { %v407_v52 = vadd.f32 %v812_v51, %v1060_v34  ;;  %v398_v54 = vpop.f32.mrb[5].mxu0  ;;  %v535_v55 = vadd.f32 %v844_v53, %v1060_v34  ;;  %v526_v57 = vpop.f32.mrb[5].mxu1 }
  0xe3   :  { %v399_v56 = vadd.f32 %v1060_v34, %v398_v54  ;;  %v813_v58 = vpop.f32.mrb[6].mxu0  ;;  %v527_v59 = vadd.f32 %v1060_v34, %v526_v57  ;;  %v845_v61 = vpop.f32.mrb[6].mxu1 }
  0xe4   :  { %644 = vst.msk [vmem:[%s1385_s3 + $0x30] sm:$0xff] %vm637_vm2, %v407_v52  ;;  %v410_v60 = vadd.f32 %v813_v58, %v1060_v34  ;;  %v401_v62 = vpop.f32.mrb[7].mxu0  ;;  %676 = vst.msk [vmem:[%s1385_s3 + $0x130] sm:$0xff] %vm637_vm2, %v535_v55  ;;  %v538_v63 = vadd.f32 %v845_v61, %v1060_v34  ;;  %v529_v1 = vpop.f32.mrb[7].mxu1 }
  0xe5   :  { %642 = vst.msk [vmem:[%s1385_s3 + $0x20] sm:$0xff] %vm637_vm2, %v399_v56  ;;  %v402_v0 = vadd.f32 %v1060_v34, %v401_v62  ;;  %674 = vst.msk [vmem:[%s1385_s3 + $0x120] sm:$0xff] %vm637_vm2, %v527_v59  ;;  %v530_v2 = vadd.f32 %v1060_v34, %v529_v1 }
  0xe6   :  { %645 = vst.msk [vmem:[%s1385_s3 + $0x38] sm:$0xff] %vm637_vm2, %v410_v60  ;;  %677 = vst.msk [vmem:[%s1385_s3 + $0x138] sm:$0xff] %vm637_vm2, %v538_v63 }
  0xe7   :  { %643 = vst.msk [vmem:[%s1385_s3 + $0x28] sm:$0xff] %vm637_vm2, %v402_v0  ;;  %675 = vst.msk [vmem:[%s1385_s3 + $0x128] sm:$0xff] %vm637_vm2, %v530_v2 }
  0xe9   :  { %v816_v3 = vpop.f32.mrb[8].mxu0  ;;  %v848_v5 = vpop.f32.mrb[8].mxu1 }
  0xea   :  { %v423_v4 = vadd.f32 %v816_v3, %v1060_v34  ;;  %v414_v6 = vpop.f32.mrb[9].mxu0  ;;  %v551_v7 = vadd.f32 %v848_v5, %v1060_v34  ;;  %v542_v9 = vpop.f32.mrb[9].mxu1 }
  0xeb   :  { %v415_v8 = vadd.f32 %v1060_v34, %v414_v6  ;;  %v817_v10 = vpop.f32.mrb[10].mxu0  ;;  %v543_v11 = vadd.f32 %v1060_v34, %v542_v9  ;;  %v849_v13 = vpop.f32.mrb[10].mxu1 }
  0xec   :  { %648 = vst.msk [vmem:[%s1385_s3 + $0x50] sm:$0xff] %vm637_vm2, %v423_v4  ;;  %v426_v12 = vadd.f32 %v817_v10, %v1060_v34  ;;  %v417_v14 = vpop.f32.mrb[11].mxu0  ;;  %680 = vst.msk [vmem:[%s1385_s3 + $0x150] sm:$0xff] %vm637_vm2, %v551_v7  ;;  %v554_v15 = vadd.f32 %v849_v13, %v1060_v34  ;;  %v545_v17 = vpop.f32.mrb[11].mxu1 }
  0xed   :  { %646 = vst.msk [vmem:[%s1385_s3 + $0x40] sm:$0xff] %vm637_vm2, %v415_v8  ;;  %v418_v16 = vadd.f32 %v1060_v34, %v417_v14  ;;  %678 = vst.msk [vmem:[%s1385_s3 + $0x140] sm:$0xff] %vm637_vm2, %v543_v11  ;;  %v546_v18 = vadd.f32 %v1060_v34, %v545_v17 }
  0xee   :  { %649 = vst.msk [vmem:[%s1385_s3 + $0x58] sm:$0xff] %vm637_vm2, %v426_v12  ;;  %681 = vst.msk [vmem:[%s1385_s3 + $0x158] sm:$0xff] %vm637_vm2, %v554_v15 }
  0xef   :  { %647 = vst.msk [vmem:[%s1385_s3 + $0x48] sm:$0xff] %vm637_vm2, %v418_v16  ;;  %679 = vst.msk [vmem:[%s1385_s3 + $0x148] sm:$0xff] %vm637_vm2, %v546_v18 }
  0xf1   :  { %v820_v19 = vpop.f32.mrb[12].mxu0  ;;  %v852_v21 = vpop.f32.mrb[12].mxu1 }
  0xf2   :  { %v439_v20 = vadd.f32 %v820_v19, %v1060_v34  ;;  %v430_v22 = vpop.f32.mrb[13].mxu0  ;;  %v567_v23 = vadd.f32 %v852_v21, %v1060_v34  ;;  %v558_v25 = vpop.f32.mrb[13].mxu1 }
  0xf3   :  { %v431_v24 = vadd.f32 %v1060_v34, %v430_v22  ;;  %v821_v26 = vpop.f32.mrb[14].mxu0  ;;  %v559_v27 = vadd.f32 %v1060_v34, %v558_v25  ;;  %v853_v29 = vpop.f32.mrb[14].mxu1 }
  0xf4   :  { %652 = vst.msk [vmem:[%s1385_s3 + $0x70] sm:$0xff] %vm637_vm2, %v439_v20  ;;  %v442_v28 = vadd.f32 %v821_v26, %v1060_v34  ;;  %v433_v30 = vpop.f32.mrb[15].mxu0  ;;  %684 = vst.msk [vmem:[%s1385_s3 + $0x170] sm:$0xff] %vm637_vm2, %v567_v23  ;;  %v570_v31 = vadd.f32 %v853_v29, %v1060_v34  ;;  %v561_v33 = vpop.f32.mrb[15].mxu1 }
  0xf5   :  { %650 = vst.msk [vmem:[%s1385_s3 + $0x60] sm:$0xff] %vm637_vm2, %v431_v24  ;;  %v434_v32 = vadd.f32 %v1060_v34, %v433_v30  ;;  %682 = vst.msk [vmem:[%s1385_s3 + $0x160] sm:$0xff] %vm637_vm2, %v559_v27  ;;  %v562_v35 = vadd.f32 %v1060_v34, %v561_v33 }
  0xf6   :  { %653 = vst.msk [vmem:[%s1385_s3 + $0x78] sm:$0xff] %vm637_vm2, %v442_v28  ;;  %685 = vst.msk [vmem:[%s1385_s3 + $0x178] sm:$0xff] %vm637_vm2, %v570_v31 }
  0xf7   :  { %651 = vst.msk [vmem:[%s1385_s3 + $0x68] sm:$0xff] %vm637_vm2, %v434_v32  ;;  %683 = vst.msk [vmem:[%s1385_s3 + $0x168] sm:$0xff] %vm637_vm2, %v562_v35 }
  0xf9   :  { %v824_v36 = vpop.f32.mrb[16].mxu0  ;;  %v856_v38 = vpop.f32.mrb[16].mxu1 }
  0xfa   :  { %v455_v37 = vadd.f32 %v824_v36, %v1060_v34  ;;  %v446_v39 = vpop.f32.mrb[17].mxu0  ;;  %v583_v40 = vadd.f32 %v856_v38, %v1060_v34  ;;  %v574_v42 = vpop.f32.mrb[17].mxu1 }
  0xfb   :  { %v447_v41 = vadd.f32 %v1060_v34, %v446_v39  ;;  %v825_v43 = vpop.f32.mrb[18].mxu0  ;;  %v575_v44 = vadd.f32 %v1060_v34, %v574_v42  ;;  %v857_v46 = vpop.f32.mrb[18].mxu1 }
  0xfc   :  { %656 = vst.msk [vmem:[%s1385_s3 + $0x90] sm:$0xff] %vm637_vm2, %v455_v37  ;;  %v458_v45 = vadd.f32 %v825_v43, %v1060_v34  ;;  %v449_v47 = vpop.f32.mrb[19].mxu0  ;;  %688 = vst.msk [vmem:[%s1385_s3 + $0x190] sm:$0xff] %vm637_vm2, %v583_v40  ;;  %v586_v48 = vadd.f32 %v857_v46, %v1060_v34  ;;  %v577_v50 = vpop.f32.mrb[19].mxu1 }
  0xfd   :  { %654 = vst.msk [vmem:[%s1385_s3 + $0x80] sm:$0xff] %vm637_vm2, %v447_v41  ;;  %v450_v49 = vadd.f32 %v1060_v34, %v449_v47  ;;  %686 = vst.msk [vmem:[%s1385_s3 + $0x180] sm:$0xff] %vm637_vm2, %v575_v44  ;;  %v578_v51 = vadd.f32 %v1060_v34, %v577_v50 }
  0xfe   :  { %657 = vst.msk [vmem:[%s1385_s3 + $0x98] sm:$0xff] %vm637_vm2, %v458_v45  ;;  %689 = vst.msk [vmem:[%s1385_s3 + $0x198] sm:$0xff] %vm637_vm2, %v586_v48 }
  0xff   :  { %655 = vst.msk [vmem:[%s1385_s3 + $0x88] sm:$0xff] %vm637_vm2, %v450_v49  ;;  %687 = vst.msk [vmem:[%s1385_s3 + $0x188] sm:$0xff] %vm637_vm2, %v578_v51 }
 0x101   :  { %v828_v52 = vpop.f32.mrb[20].mxu0  ;;  %v860_v54 = vpop.f32.mrb[20].mxu1 }
 0x102   :  { %v471_v53 = vadd.f32 %v828_v52, %v1060_v34  ;;  %v462_v55 = vpop.f32.mrb[21].mxu0  ;;  %v599_v56 = vadd.f32 %v860_v54, %v1060_v34  ;;  %v590_v58 = vpop.f32.mrb[21].mxu1 }
 0x103   :  { %v463_v57 = vadd.f32 %v1060_v34, %v462_v55  ;;  %v829_v59 = vpop.f32.mrb[22].mxu0  ;;  %v591_v60 = vadd.f32 %v1060_v34, %v590_v58  ;;  %v861_v62 = vpop.f32.mrb[22].mxu1 }
 0x104   :  { %660 = vst.msk [vmem:[%s1385_s3 + $0xb0] sm:$0xff] %vm637_vm2, %v471_v53  ;;  %v474_v61 = vadd.f32 %v829_v59, %v1060_v34  ;;  %v465_v63 = vpop.f32.mrb[23].mxu0  ;;  %692 = vst.msk [vmem:[%s1385_s3 + $0x1b0] sm:$0xff] %vm637_vm2, %v599_v56  ;;  %v602_v0 = vadd.f32 %v861_v62, %v1060_v34  ;;  %v593_v2 = vpop.f32.mrb[23].mxu1 }
 0x105   :  { %658 = vst.msk [vmem:[%s1385_s3 + $0xa0] sm:$0xff] %vm637_vm2, %v463_v57  ;;  %v466_v1 = vadd.f32 %v1060_v34, %v465_v63  ;;  %690 = vst.msk [vmem:[%s1385_s3 + $0x1a0] sm:$0xff] %vm637_vm2, %v591_v60  ;;  %v594_v3 = vadd.f32 %v1060_v34, %v593_v2 }
 0x106   :  { %661 = vst.msk [vmem:[%s1385_s3 + $0xb8] sm:$0xff] %vm637_vm2, %v474_v61  ;;  %693 = vst.msk [vmem:[%s1385_s3 + $0x1b8] sm:$0xff] %vm637_vm2, %v602_v0 }
 0x107   :  { %659 = vst.msk [vmem:[%s1385_s3 + $0xa8] sm:$0xff] %vm637_vm2, %v466_v1  ;;  %691 = vst.msk [vmem:[%s1385_s3 + $0x1a8] sm:$0xff] %vm637_vm2, %v594_v3 }
 0x109   :  { %v832_v4 = vpop.f32.mrb[24].mxu0  ;;  %v864_v6 = vpop.f32.mrb[24].mxu1 }
 0x10a   :  { %v487_v5 = vadd.f32 %v832_v4, %v1060_v34  ;;  %v478_v7 = vpop.f32.mrb[25].mxu0  ;;  %v615_v8 = vadd.f32 %v864_v6, %v1060_v34  ;;  %v606_v10 = vpop.f32.mrb[25].mxu1 }
 0x10b   :  { %v479_v9 = vadd.f32 %v1060_v34, %v478_v7  ;;  %v833_v11 = vpop.f32.mrb[26].mxu0  ;;  %v607_v12 = vadd.f32 %v1060_v34, %v606_v10  ;;  %v865_v14 = vpop.f32.mrb[26].mxu1 }
 0x10c   :  { %664 = vst.msk [vmem:[%s1385_s3 + $0xd0] sm:$0xff] %vm637_vm2, %v487_v5  ;;  %v490_v13 = vadd.f32 %v833_v11, %v1060_v34  ;;  %v481_v15 = vpop.f32.mrb[27].mxu0  ;;  %696 = vst.msk [vmem:[%s1385_s3 + $0x1d0] sm:$0xff] %vm637_vm2, %v615_v8  ;;  %v618_v16 = vadd.f32 %v865_v14, %v1060_v34  ;;  %v609_v18 = vpop.f32.mrb[27].mxu1 }
 0x10d   :  { %662 = vst.msk [vmem:[%s1385_s3 + $0xc0] sm:$0xff] %vm637_vm2, %v479_v9  ;;  %v482_v17 = vadd.f32 %v1060_v34, %v481_v15  ;;  %694 = vst.msk [vmem:[%s1385_s3 + $0x1c0] sm:$0xff] %vm637_vm2, %v607_v12  ;;  %v610_v19 = vadd.f32 %v1060_v34, %v609_v18 }
 0x10e   :  { %665 = vst.msk [vmem:[%s1385_s3 + $0xd8] sm:$0xff] %vm637_vm2, %v490_v13  ;;  %697 = vst.msk [vmem:[%s1385_s3 + $0x1d8] sm:$0xff] %vm637_vm2, %v618_v16 }
 0x10f   :  { %663 = vst.msk [vmem:[%s1385_s3 + $0xc8] sm:$0xff] %vm637_vm2, %v482_v17  ;;  %695 = vst.msk [vmem:[%s1385_s3 + $0x1c8] sm:$0xff] %vm637_vm2, %v610_v19 }
 0x111   :  { %v836_v20 = vpop.f32.mrb[28].mxu0  ;;  %v868_v22 = vpop.f32.mrb[28].mxu1 }
 0x112   :  { %v503_v21 = vadd.f32 %v836_v20, %v1060_v34  ;;  %v494_v23 = vpop.f32.mrb[29].mxu0  ;;  %v631_v24 = vadd.f32 %v868_v22, %v1060_v34  ;;  %v622_v26 = vpop.f32.mrb[29].mxu1 }
 0x113   :  { %v495_v25 = vadd.f32 %v1060_v34, %v494_v23  ;;  %v837_v27 = vpop.f32.mrb[30].mxu0  ;;  %v623_v28 = vadd.f32 %v1060_v34, %v622_v26  ;;  %v869_v30 = vpop.f32.mrb[30].mxu1 }
 0x114   :  { %668 = vst.msk [vmem:[%s1385_s3 + $0xf0] sm:$0xff] %vm637_vm2, %v503_v21  ;;  %v506_v29 = vadd.f32 %v837_v27, %v1060_v34  ;;  %v497_v31 = vpop.f32.mrb[31].mxu0  ;;  %700 = vst.msk [vmem:[%s1385_s3 + $0x1f0] sm:$0xff] %vm637_vm2, %v631_v24  ;;  %v634_v32 = vadd.f32 %v869_v30, %v1060_v34  ;;  %v625_v35 = vpop.f32.mrb[31].mxu1 }
 0x115   :  { %666 = vst.msk [vmem:[%s1385_s3 + $0xe0] sm:$0xff] %vm637_vm2, %v495_v25  ;;  %v498_v33 = vadd.f32 %v1060_v34, %v497_v31  ;;  %698 = vst.msk [vmem:[%s1385_s3 + $0x1e0] sm:$0xff] %vm637_vm2, %v623_v28  ;;  %v626_v36 = vadd.f32 %v1060_v34, %v625_v35 }
 0x116   :  { %669 = vst.msk [vmem:[%s1385_s3 + $0xf8] sm:$0xff] %vm637_vm2, %v506_v29  ;;  %701 = vst.msk [vmem:[%s1385_s3 + $0x1f8] sm:$0xff] %vm637_vm2, %v634_v32 }
 0x117   :  { %667 = vst.msk [vmem:[%s1385_s3 + $0xe8] sm:$0xff] %vm637_vm2, %v498_v33  ;;  %699 = vst.msk [vmem:[%s1385_s3 + $0x1e8] sm:$0xff] %vm637_vm2, %v626_v36 }

// kernel: tile.13
= control target key start
LH: loop header
LB: loop body
LE: loop exit
PB: predicated region body
PF: predicated region fallthrough
CT: control target
= control target key end

     0   :  { %s40_s0 = inlined_call_operand.vmem [shape: f32[8], index: 0, kind: input, shape index: {}]   ;;  %s41_s1 = inlined_call_operand.vmem [shape: f32[32,8], index: 1, kind: output, shape index: {}]  }
   0x1   :  { %v4_v0 = vld [vmem:[%s40_s0] ss:$0 sm:$0xff] }
   0x2   :  { %5 = vst [vmem:[%s41_s1] sm:$0xff] %v4_v0  ;;  %12 = vst [vmem:[%s41_s1 + $0x8] sm:$0xff] %v4_v0 }
   0x3   :  { %13 = vst [vmem:[%s41_s1 + $0x10] sm:$0xff] %v4_v0  ;;  %14 = vst [vmem:[%s41_s1 + $0x18] sm:$0xff] %v4_v0 }

// kernel: tile.14
= control target key start
LH: loop header
LB: loop body
LE: loop exit
PB: predicated region body
PF: predicated region fallthrough
CT: control target
= control target key end

     0   :  { %s7_s6 = smov 3  ;;  %s21_s9 = smov 3  ;;  %vm4_vm0 = vcmask 64512   ;;  %vm11_vm1 = vcmask 1048512   ;;  %vm18_vm2 = vcmask 982912   ;;  %vm25_vm3 = vcmask 917312   ;;  %s232_s0 = inlined_call_operand.vmem [shape: f32[32,8], index: 0, kind: input, shape index: {}]   ;;  %s233_s1 = inlined_call_operand.vmem [shape: f32[1,256], index: 1, kind: output, shape index: {}]  }
   0x1   :  { %v122_v0 = vld [vmem:[%s232_s0 + $0xf] ss:$16 sm:%s7_s6]   ;;  %s153_s10 = smov 120   ;;  %v124_v1 = vld [vmem:[%s232_s0 + $0xd] ss:$16 sm:%s21_s9]   ;;  %s14_s13 = smov 3 }
   0x2   :  { %9 = vrot.lane.b32.xlu0 %v122_v0, %s153_s10  ;;  %s154_s14 = smov 104   ;;  %v123_v2 = vld [vmem:[%s232_s0 + $0xe] ss:$16 sm:%s14_s13]   ;;  %s28_s17 = smov 3  ;;  %vm32_vm4 = vcmask 851712   ;;  %vm39_vm5 = vcmask 786112  }
   0x3   :  { %23 = vrot.lane.b32.xlu1 %v124_v1, %s154_s14  ;;  %v125_v3 = vld [vmem:[%s232_s0 + $0xc] ss:$16 sm:%s28_s17]   ;;  %s35_s20 = smov 3  ;;  %s42_s21 = smov 3  ;;  %vm46_vm6 = vcmask 720512   ;;  %vm53_vm7 = vcmask 654912  }
   0x4   :  { %s155_s22 = smov 112   ;;  %s156_s23 = smov 96   ;;  %v126_v4 = vld [vmem:[%s232_s0 + $0xb] ss:$16 sm:%s35_s20]   ;;  %v127_v5 = vld [vmem:[%s232_s0 + $0xa] ss:$16 sm:%s42_s21]  }
   0x5   :  { %s49_s28 = smov 3  ;;  %s56_s29 = smov 3  ;;  %vm60_vm8 = vcmask 589312   ;;  %vm67_vm9 = vcmask 523712   ;;  %vm74_vm10 = vcmask 458112   ;;  %vm81_vm11 = vcmask 392512  }
   0x6   :  { %16 = vrot.lane.b32.xlu0 %v123_v2, %s155_s22  ;;  %s157_s30 = smov 88   ;;  %s158_s2 = smov 80   ;;  %v128_v6 = vld [vmem:[%s232_s0 + $0x9] ss:$16 sm:%s49_s28]   ;;  %vm88_vm12 = vcmask 326912   ;;  %vm95_vm13 = vcmask 261312  }
   0x7   :  { %30 = vrot.lane.b32.xlu1 %v125_v3, %s156_s23  ;;  %v129_v7 = vld [vmem:[%s232_s0 + $0x8] ss:$16 sm:%s56_s29]   ;;  %s63_s7 = smov 3  ;;  %s70_s8 = smov 3  ;;  %vm102_vm14 = vcmask 195712   ;;  %vm109_vm15 = vcmask 130112  }
   0x8   :  { %s159_s9 = smov 72   ;;  %s160_s10 = smov 64   ;;  %v130_v8 = vld [vmem:[%s232_s0 + $0x7] ss:$16 sm:%s63_s7]   ;;  %v131_v9 = vld [vmem:[%s232_s0 + $0x6] ss:$16 sm:%s70_s8]  }
   0x9   :  { %s2_s13 = smov 3  ;;  %s77_s16 = smov 3 }
   0xa   :  { %37 = vrot.lane.b32.xlu0 %v126_v4, %s157_s30  ;;  %v3_v10 = vld [vmem:[%s232_s0] ss:$16 sm:%s2_s13]   ;;  %s84_s19 = smov 3  ;;  %s161_s20 = smov 56  }
   0xb   :  { %44 = vrot.lane.b32.xlu1 %v127_v5, %s158_s2  ;;  %5 = vst.msk [vmem:[#allocation0] ss:$8 sm:$0x3] %vm4_vm0, %v3_v10   ;;  %s162_s21 = smov 48   ;;  %v132_v11 = vld [vmem:[%s232_s0 + $0x5] ss:$16 sm:%s77_s16]  }
   0xc   :  { %v133_v12 = vld [vmem:[%s232_s0 + $0x4] ss:$16 sm:%s84_s19]   ;;  %s91_s26 = smov 3  ;;  %s98_s27 = smov 3 }
   0xd   :  { %s163_s28 = smov 40   ;;  %s164_s29 = smov 32   ;;  %v134_v13 = vld [vmem:[%s232_s0 + $0x3] ss:$16 sm:%s91_s26]   ;;  %v135_v14 = vld [vmem:[%s232_s0 + $0x2] ss:$16 sm:%s98_s27]  }
   0xe   :  { %51 = vrot.lane.b32.xlu0 %v128_v6, %s159_s9  ;;  %s105_s5 = smov 3  ;;  %s165_s6 = smov 24  }
   0xf   :  { %58 = vrot.lane.b32.xlu1 %v129_v7, %s160_s10  ;;  %s166_s7 = smov 16   ;;  %v136_v15 = vld [vmem:[%s232_s0 + $0x1] ss:$16 sm:%s105_s5]   ;;  %s167_s0 = smov 8  }
  0x12   :  { %65 = vrot.lane.b32.xlu0 %v130_v8, %s161_s20 }
  0x13   :  { %72 = vrot.lane.b32.xlu1 %v131_v9, %s162_s21 }
  0x16   :  { %79 = vrot.lane.b32.xlu0 %v132_v11, %s163_s28 }
  0x17   :  { %86 = vrot.lane.b32.xlu1 %v133_v12, %s164_s29 }
  0x1a   :  { %93 = vrot.lane.b32.xlu0 %v134_v13, %s165_s6 }
  0x1b   :  { %100 = vrot.lane.b32.xlu1 %v135_v14, %s166_s7 }
  0x1e   :  { %107 = vrot.lane.b32.xlu0 %v136_v15, %s167_s0 }
  0x74   :  { %v10_v16 = vpop.permute.xlu0 %9  }
  0x75   :  { %12 = vst.msk [vmem:[#allocation0] ss:$8 sm:$0x3] %vm11_vm1, %v10_v16   ;;  %v24_v17 = vpop.permute.xlu1 %23  }
  0x78   :  { %v17_v18 = vpop.permute.xlu0 %16  }
  0x79   :  { %19 = vst.msk [vmem:[#allocation0] ss:$8 sm:$0x3] %vm18_vm2, %v17_v18   ;;  %v31_v19 = vpop.permute.xlu1 %30  }
  0x7a   :  { %26 = vst.msk [vmem:[#allocation0] ss:$8 sm:$0x3] %vm25_vm3, %v24_v17  }
  0x7b   :  { %33 = vst.msk [vmem:[#allocation0] ss:$8 sm:$0x3] %vm32_vm4, %v31_v19  }
  0x7c   :  { %v38_v20 = vpop.permute.xlu0 %37  }
  0x7d   :  { %40 = vst.msk [vmem:[#allocation0] ss:$8 sm:$0x3] %vm39_vm5, %v38_v20   ;;  %v45_v21 = vpop.permute.xlu1 %44  }
  0x7e   :  { %47 = vst.msk [vmem:[#allocation0] ss:$8 sm:$0x3] %vm46_vm6, %v45_v21  }
  0x80   :  { %v52_v22 = vpop.permute.xlu0 %51  }
  0x81   :  { %54 = vst.msk [vmem:[#allocation0] ss:$8 sm:$0x3] %vm53_vm7, %v52_v22   ;;  %v59_v23 = vpop.permute.xlu1 %58  }
  0x82   :  { %61 = vst.msk [vmem:[#allocation0] ss:$8 sm:$0x3] %vm60_vm8, %v59_v23  }
  0x84   :  { %v66_v24 = vpop.permute.xlu0 %65  }
  0x85   :  { %68 = vst.msk [vmem:[#allocation0] ss:$8 sm:$0x3] %vm67_vm9, %v66_v24   ;;  %v73_v25 = vpop.permute.xlu1 %72  }
  0x86   :  { %75 = vst.msk [vmem:[#allocation0] ss:$8 sm:$0x3] %vm74_vm10, %v73_v25  }
  0x88   :  { %v80_v26 = vpop.permute.xlu0 %79  }
  0x89   :  { %82 = vst.msk [vmem:[#allocation0] ss:$8 sm:$0x3] %vm81_vm11, %v80_v26   ;;  %v87_v27 = vpop.permute.xlu1 %86  }
  0x8a   :  { %89 = vst.msk [vmem:[#allocation0] ss:$8 sm:$0x3] %vm88_vm12, %v87_v27  }
  0x8c   :  { %v94_v28 = vpop.permute.xlu0 %93  }
  0x8d   :  { %96 = vst.msk [vmem:[#allocation0] ss:$8 sm:$0x3] %vm95_vm13, %v94_v28   ;;  %v101_v29 = vpop.permute.xlu1 %100  }
  0x8e   :  { %103 = vst.msk [vmem:[#allocation0] ss:$8 sm:$0x3] %vm102_vm14, %v101_v29  }
  0x90   :  { %v108_v30 = vpop.permute.xlu0 %107  }
  0x91   :  { %110 = vst.msk [vmem:[#allocation0] ss:$8 sm:$0x3] %vm109_vm15, %v108_v30  }
  0x98   :  { %v114_v31 = vld [vmem:[#allocation0] sm:$0x1]  ;;  %v118_v32 = vld [vmem:[#allocation0 + $0x8] sm:$0x1] }
  0x99   :  { %116 = vst [vmem:[%s233_s1] sm:$0x1] %v114_v31  ;;  %137 = vst [vmem:[%s233_s1 + $0x1] sm:$0x1] %v118_v32 }

// kernel: up_dysample_forward.4
= control target key start
LH: loop header
LB: loop body
LE: loop exit
PB: predicated region body
PF: predicated region fallthrough
CT: control target
= control target key end

     0   :  { %s1915_s9 = smov 0   ;;  %s1917_s10 = smov 0   ;;  %s2364_s0 = inlined_call_operand.vmem [shape: bf16[2,1,34,272], index: 0, kind: input, shape index: {}]   ;;  %s2365_s1 = inlined_call_operand.vmem [shape: bf16[3,272,256], index: 1, kind: input, shape index: {}]   ;;  %s2366_s2 = inlined_call_operand.vmem [shape: f32[2,2,256], index: 2, kind: output, shape index: {}]  }
   0x1   :  { %s1919_s11 = smov 0  }
   0x2 LB: > { %s24_s12 = sadd.s32 1, %s1891_s10  ;;  %p1444_p0 = scmp.ge.s32.totalorder %s1895_s11, 1  ;;  %s1895_s11 = sphi %s1919_s11, %s12_s11   ;;  %s1891_s10 = sphi %s1917_s10, %s2368_s10   ;;  %s1887_s9 = sphi %s1915_s9, %s2367_s9  }
   0x3   : > { %p26_p1 = scmp.ge.s32.totalorder %s24_s12, 2  ;;  %p130_p2 = scmp.lt.s32.totalorder %s1895_s11, 3 }
   0x5   : > { %s2370_s12 = smov (%p26_p1, %s24_s12), 0  ;;  %p131_p3 = pnand %p1444_p0, %p130_p2 }
   0x6   : > { %v1707_v0 = vld [vmem:[%s2365_s1 + $0x114] ss:$8 sps:$4 sm:$0xff] (!%p131_p3)   ;;  %p156_p4 = scmp.lt.s32.totalorder (!%p131_p3), %s1887_s9, 1  ;;  %v1709_v1 = vld [vmem:[%s2365_s1 + $0x110] ss:$8 sps:$4 sm:$0xff] (!%p131_p3)   ;;  %v1897_v2 = vmov (!%p131_p3), 0  }
   0x7   : > { %134 = sbr.rel (%p131_p3) target bundleno = 386 (0x182), region = 28  ;;  %616 = vmatprep.mubr.bf16.mxu0 (!%p131_p3), %v1897_v2  ;;  %531 = vmatprep.subr.bf16.mxu1 (!%p131_p3), %v1707_v0  ;;  %v1710_v3 = vld [vmem:[%s2365_s1 + $0x124] ss:$8 sps:$4 sm:$0xff] (!%p131_p3)   ;;  %v1712_v4 = vld [vmem:[%s2365_s1 + $0x120] ss:$8 sps:$4 sm:$0xff] (!%p131_p3)   ;;  %vm524_vm1 = vcmask (!%p131_p3), 130048  }
   0x8   : > { %532 = vmatpush1.bf16.msra.mxu1 (!%p131_p3), %v1709_v1  ;;  %v1713_v5 = vld [vmem:[%s2365_s1 + $0x134] ss:$8 sps:$4 sm:$0xff] (!%p131_p3)   ;;  %v1718_v7 = vld [vmem:[%s2365_s1 + $0x210] ss:$8 sps:$4 sm:$0xff] (!%p131_p3)   ;;  %v1719_v9 = vld [vmem:[%s2365_s1 + $0x144] ss:$8 sps:$4 sm:$0xff] (!%p131_p3)  }
   0x9   : > { %533 = vmatprep.subr.bf16.mxu1 (!%p131_p3), %v1710_v3  ;;  %v1716_v6 = vld [vmem:[%s2365_s1 + $0x214] ss:$8 sps:$4 sm:$0xff] (!%p131_p3)   ;;  %v1715_v8 = vld [vmem:[%s2365_s1 + $0x130] ss:$8 sps:$4 sm:$0xff] (!%p131_p3)   ;;  %v1721_v14 = vld [vmem:[%s2365_s1 + $0x140] ss:$8 sps:$4 sm:$0xff] (!%p131_p3)  }
   0xa   : > { %584 = vmatprep.subr.bf16.mxu0 (!%p131_p3), %v1716_v6  ;;  %v1724_v18 = vld [vmem:[%s2365_s1 + $0x154] ss:$8 sps:$4 sm:$0xff] (!%p131_p3)   ;;  %vm289_vm0 = vsmask.f32 (!%p131_p3), 7424  ;;  %v1734_v25 = vld [vmem:[%s2365_s1 + $0x100] ss:$8 sps:$4 sm:$0xff] (!%p131_p3)  }
   0xb   : > { %585 = vmatpush1.bf16.msra.mxu0 (!%p131_p3), %v1718_v7  ;;  %v1736_v26 = vld [vmem:[%s2365_s1 + $0x104] ss:$8 sps:$4 sm:$0xff] (!%p131_p3)   ;;  %v1726_v27 = vld [vmem:[%s2365_s1 + $0x150] ss:$8 sps:$4 sm:$0xff] (!%p131_p3)   ;;  %vm966_vm2 = vcmask (!%p131_p3), 1046528   ;;  %vm1351_vm3 = vcmask (!%p131_p3), 1040384  }
   0xc   : > { %534 = vmatpush1.bf16.msra.mxu1 (!%p131_p3), %v1712_v4  ;;  %v1727_v31 = vld [vmem:[%s2365_s1 + $0x164] ss:$8 sps:$4 sm:$0xff] (!%p131_p3)   ;;  %868 = vmatprep.subr.bf16.mxu0 (!%p131_p3), %v1736_v26  ;;  %v1729_v36 = vld [vmem:[%s2365_s1 + $0x160] ss:$8 sps:$4 sm:$0xff] (!%p131_p3)   ;;  %v1731_v37 = vld [vmem:[%s2365_s1 + $0x174] ss:$8 sps:$4 sm:$0xff] (!%p131_p3)  }
   0xd   : > { %535 = vmatprep.subr.bf16.mxu1 (!%p131_p3), %v1713_v5  ;;  %v1742_v32 = vld [vmem:[%s2365_s1 + $0x224] ss:$8 sps:$4 sm:$0xff] (!%p131_p3)   ;;  %v1733_v39 = vld [vmem:[%s2365_s1 + $0x170] ss:$8 sps:$4 sm:$0xff] (!%p131_p3)   ;;  %v1739_v41 = vld [vmem:[%s2365_s1 + $0x180] ss:$8 sps:$4 sm:$0xff] (!%p131_p3)  }
   0xe   : > { %s2372_s9 = smov (!%p156_p4, %s1887_s9), 1  ;;  %v1737_v40 = vld [vmem:[%s2365_s1 + $0x184] ss:$8 sps:$4 sm:$0xff]   ;;  %v1743_v42 = vld [vmem:[%s2365_s1 + $0x194] ss:$8 sps:$4 sm:$0xff]  }
   0xf   : > { %s1679_s25 = smul.u32 60, %s2372_s9  ;;  %v1740_v43 = vld [vmem:[%s2365_s1 + $0x220] ss:$8 sps:$4 sm:$0xff]   ;;  %v1745_v44 = vld [vmem:[%s2365_s1 + $0x190] ss:$8 sps:$4 sm:$0xff]   ;;  %s1638_s4 = sshll.u32 %s2372_s9, 2 }
  0x10   : > { %536 = vmatpush1.bf16.msra.mxu1 %v1715_v8  ;;  %v1748_v45 = vld [vmem:[%s2365_s1 + $0x234] ss:$8 sps:$4 sm:$0xff]   ;;  %v1749_v46 = vld [vmem:[%s2365_s1 + $0x1a4] ss:$8 sps:$4 sm:$0xff]   ;;  %v1746_v47 = vld [vmem:[%s2365_s1 + $0x230] ss:$8 sps:$4 sm:$0xff]   ;;  %s2350_s8 = scalar_lea.vmem %s2366_s2, %s1638_s4 }
  0x11   : > { %s1967_s6 = scalar_lea.vmem %s2364_s0, %s1679_s25  ;;  %537 = vmatprep.subr.bf16.mxu1 %v1719_v9  ;;  %v1751_v48 = vld [vmem:[%s2365_s1 + $0x1a0] ss:$8 sps:$4 sm:$0xff]   ;;  %v1754_v49 = vld [vmem:[%s2365_s1 + $0x244] ss:$8 sps:$4 sm:$0xff]   ;;  %v1755_v50 = vld [vmem:[%s2365_s1 + $0x1b4] ss:$8 sps:$4 sm:$0xff]  }
  0x12   : > { %v177_v10 = vld [vmem:[%s1967_s6 + $0x8] sm:$0xf]  ;;  %v1971_v11 = vld [vmem:[%s1967_s6 + $0x14] sm:$0xf]  ;;  %v1975_v13 = vld [vmem:[%s1967_s6 + $0x20] ss:$12 sps:$4 sm:$0xff]  }
  0x13   : > { %v1484_v12 = vcombine.low %v177_v10, %v1971_v11  ;;  %v322_v17 = vshll.u32 %v1975_v13, 16  ;;  %v1730_v21 = vld [vmem:[%s1967_s6 + $0x38] ss:$0 sps:$4 sm:$0x11]   ;;  %v342_v22 = vshrl.u32 %v1975_v13, 16  ;;  %v974_v28 = vrot.slane %v1975_v13, 1 }
  0x14   : > { %v346_v24 = vshll.u32 %v1730_v21, 16  ;;  %538 = vmatpush1.bf16.msra.mxu1 %v1721_v14  ;;  %v980_v29 = vrot.slane %v1730_v21, 1  ;;  %v1752_v51 = vld [vmem:[%s2365_s1 + $0x240] ss:$8 sps:$4 sm:$0xff]   ;;  %v1757_v52 = vld [vmem:[%s2365_s1 + $0x1b0] ss:$8 sps:$4 sm:$0xff]  }
  0x15   : > { %v315_v15 = vshrl.u32 %v1484_v12, 16  ;;  %v317_v16 = vshll.u32 %v1484_v12, 16  ;;  %v324_v20 = vrot.slane %v322_v17, 1  ;;  %539 = vmatprep.subr.bf16.mxu1 %v1724_v18  ;;  %v1760_v53 = vld [vmem:[%s2365_s1 + $0x254] ss:$8 sps:$4 sm:$0xff]   ;;  %v176_v54 = vld [vmem:[%s1967_s6] sm:$0xff] }
  0x16   : > { %v2007_v33 = vsel %vm966_vm2, %v974_v28, %v980_v29  ;;  %v348_v35 = vrot.slane %v346_v24, 1  ;;  %v2068_v55 = vld [vmem:[%s1967_s6 + $0xc] sm:$0xff]  ;;  %v2077_v58 = vld [vmem:[%s1967_s6 + $0x1c] ss:$12 sps:$4 sm:$0xff]   ;;  %v2123_v18 = vld [vmem:[%s1967_s6 + $0x18] ss:$12 sps:$4 sm:$0xff]  }
  0x17   : > { %v319_v19 = vrot.slane %v317_v16, 1  ;;  %v344_v34 = vor.u32 %v342_v22, %v324_v20  ;;  %v1761_v56 = vld [vmem:[%s2365_s1 + $0x1c4] ss:$8 sps:$4 sm:$0xff]   ;;  %v2074_v57 = vcombine.high %v176_v54, %v2068_v55  ;;  %v1758_v59 = vld [vmem:[%s2365_s1 + $0x250] ss:$8 sps:$4 sm:$0xff]   ;;  %v310_v63 = vshll.u32 %v2077_v58, 16 }
  0x18   : > { %540 = vmatpush1.bf16.msra.mxu1 %v1726_v27  ;;  %v1763_v60 = vld [vmem:[%s2365_s1 + $0x1c0] ss:$8 sps:$4 sm:$0xff]   ;;  %v1766_v0 = vld [vmem:[%s2365_s1 + $0x264] ss:$8 sps:$4 sm:$0xff]   ;;  %v1767_v1 = vld [vmem:[%s2365_s1 + $0x1d4] ss:$8 sps:$4 sm:$0xff]   ;;  %v2106_v9 = vcombine.low %v176_v54, %v2068_v55 }
  0x19   : > { %v320_v23 = vor.u32 %v319_v19, %v315_v15  ;;  %541 = vmatprep.subr.bf16.mxu1 %v1727_v31  ;;  %v349_v38 = vsel %vm289_vm0, %v344_v34, %v348_v35  ;;  %v303_v61 = vshrl.u32 %v2074_v57, 16  ;;  %v305_v62 = vshll.u32 %v2074_v57, 16  ;;  %v1764_v5 = vld [vmem:[%s2365_s1 + $0x260] ss:$8 sps:$4 sm:$0xff]   ;;  %v1769_v7 = vld [vmem:[%s2365_s1 + $0x1d0] ss:$8 sps:$4 sm:$0xff]  }
  0x1a   : > { %v312_v4 = vrot.slane %v310_v63, 1  ;;  %v1772_v8 = vld [vmem:[%s2365_s1 + $0x274] ss:$8 sps:$4 sm:$0xff]   ;;  %v1770_v10 = vld [vmem:[%s2365_s1 + $0x270] ss:$8 sps:$4 sm:$0xff]   ;;  %v293_v19 = vshll.u32 %v2106_v9, 16 }
  0x1b   : > { %v325_v30 = vsel %vm289_vm0, %v320_v23, %v324_v20  ;;  %v307_v3 = vrot.slane %v305_v62, 1  ;;  %v1775_v15 = vld [vmem:[%s2365_s1 + $0x1e0] ss:$8 sps:$4 sm:$0xff]   ;;  %v218_v16 = vld [vmem:[%s1967_s6 + $0x30] sm:$0x11]  ;;  %v298_v27 = vshll.u32 %v2123_v18, 16 }
  0x1c   : > { %1525 = vmatmul.mubr.msk.bf16.vlgmr.msra.gmra.mrb[0].mxu0 %vm524_vm1, %v325_v30  ;;  %542 = vmatpush1.bf16.msra.mxu1 %v1729_v36  ;;  %v1778_v17 = vld [vmem:[%s2365_s1 + $0x284] ss:$8 sps:$4 sm:$0xff]   ;;  %v1779_v20 = vld [vmem:[%s2365_s1 + $0x1f4] ss:$8 sps:$4 sm:$0xff]   ;;  %v1776_v21 = vld [vmem:[%s2365_s1 + $0x280] ss:$8 sps:$4 sm:$0xff]   ;;  %v2132_v22 = vcombine.high %v218_v16, %v218_v16 }
  0x1d   : > { %626 = vmatprep.mubr.bf16.mxu0 %v1897_v2  ;;  %869 = vmatpush1.bf16.msra.mxu0 %v1734_v25  ;;  %v308_v6 = vor.u32 %v307_v3, %v303_v61  ;;  %v1781_v23 = vld [vmem:[%s2365_s1 + $0x1f0] ss:$8 sps:$4 sm:$0xff]   ;;  %v1784_v24 = vld [vmem:[%s2365_s1 + $0x294] ss:$8 sps:$4 sm:$0xff]   ;;  %v291_v25 = vshrl.u32 %v2106_v9, 16  ;;  %v295_v26 = vrot.slane %v293_v19, 1 }
  0x1e   : > { %1162 = vmatprep.subr.bf16.mxu0 %v1742_v32  ;;  %543 = vmatprep.subr.bf16.mxu1 %v1731_v37  ;;  %v1785_v29 = vld [vmem:[%s2365_s1 + $0x204] ss:$8 sps:$4 sm:$0xff]   ;;  %v334_v30 = vshrl.u32 %v2077_v58, 16  ;;  %v338_v31 = vshll.u32 %v2132_v22, 16  ;;  %v1782_v32 = vld [vmem:[%s2365_s1 + $0x290] ss:$8 sps:$4 sm:$0xff]  }
  0x1f   : > { %v313_v14 = vsel %vm289_vm0, %v308_v6, %v312_v4  ;;  %v1787_v34 = vld [vmem:[%s2365_s1 + $0x200] ss:$8 sps:$4 sm:$0xff]   ;;  %v1790_v35 = vld [vmem:[%s2365_s1 + $0x2a4] ss:$8 sps:$4 sm:$0xff]   ;;  %v296_v36 = vor.u32 %v295_v26, %v291_v25  ;;  %v300_v37 = vrot.slane %v298_v27, 1 }
  0x20   : > { %544 = vmatpush1.bf16.msra.mxu1 %v1733_v39  ;;  %563 = vmatprep.mubr.bf16.mxu1 %v313_v14  ;;  %v1798_v39 = vld [vmem:[%s2365_s1 + $0x4] ss:$8 sps:$4 sm:$0xff]   ;;  %v1799_v54 = vld [vmem:[%s2365_s1 + $0x2b0] ss:$8 sps:$4 sm:$0xff]   ;;  %v1810_v3 = vld [vmem:[%s2365_s1 + $0x20] ss:$8 sps:$4 sm:$0xff]  }
  0x21   : > { %545 = vmatprep.subr.bf16.mxu1 %v1737_v40  ;;  %v1788_v40 = vld [vmem:[%s2365_s1 + $0x2a0] ss:$8 sps:$4 sm:$0xff]   ;;  %v1812_v63 = vld [vmem:[%s2365_s1 + $0x24] ss:$8 sps:$4 sm:$0xff]   ;;  %v1815_v6 = vld [vmem:[%s2365_s1 + $0x2d4] ss:$8 sps:$4 sm:$0xff]  }
  0x22   : > { %v1821_v14 = vld [vmem:[%s2365_s1 + $0x2e4] ss:$8 sps:$4 sm:$0xff]   ;;  %v1828_v19 = vld [vmem:[%s2365_s1 + $0x50] ss:$8 sps:$4 sm:$0xff]   ;;  %v1834_v25 = vld [vmem:[%s2365_s1 + $0x60] ss:$8 sps:$4 sm:$0xff]  }
  0x23   : > { %v1839_v26 = vld [vmem:[%s2365_s1 + $0x314] ss:$8 sps:$4 sm:$0xff]  }
  0x24   : > { %1526 = vmatmul.mubr.msk.bf16.gmra.mrb[4].mxu0 %vm524_vm1, %v349_v38  ;;  %546 = vmatpush1.bf16.msra.mxu1 %v1739_v41  ;;  %v2156_v38 = vcombine.low %v218_v16, %v218_v16  ;;  %v336_v41 = vor.u32 %v334_v30, %v312_v4  ;;  %v1827_v16 = vld [vmem:[%s2365_s1 + $0x2f4] ss:$8 sps:$4 sm:$0xff]   ;;  %v968_v30 = vrot.slane %v2123_v18, 1 }
  0x25   : > { %900 = vmatprep.mubr.bf16.mxu0 %v1897_v2  ;;  %547 = vmatprep.subr.bf16.mxu1 %v1743_v42  ;;  %v340_v42 = vrot.slane %v338_v31, 1  ;;  %v1842_v27 = vld [vmem:[%s2365_s1 + $0x74] ss:$8 sps:$4 sm:$0xff]   ;;  %v1840_v31 = vld [vmem:[%s2365_s1 + $0x70] ss:$8 sps:$4 sm:$0xff]  }
  0x28   : > { %548 = vmatpush1.bf16.msra.mxu1 %v1745_v44  ;;  %v326_v44 = vshrl.u32 %v2123_v18, 16 }
  0x29   : > { %549 = vmatprep.subr.bf16.mxu1 %v1749_v46  ;;  %v301_v46 = vsel %vm289_vm0, %v296_v36, %v300_v37 }
  0x2c   : > { %1561 = vmatmul.mubr.msk.bf16.vlgmr.msra.gmra.mrb[8].mxu0 %vm524_vm1, %v1484_v12  ;;  %550 = vmatpush1.bf16.msra.mxu1 %v1751_v48  ;;  %v1773_v12 = vld [vmem:[%s2365_s1 + $0x1e4] ss:$8 sps:$4 sm:$0xff]   ;;  %v330_v48 = vshll.u32 %v2156_v38, 16 }
  0x2d   : > { %1163 = vmatpush1.bf16.msra.mxu0 %v1740_v43  ;;  %910 = vmatprep.mubr.bf16.mxu0 %v1897_v2  ;;  %v1796_v43 = vld [vmem:[%s2365_s1] ss:$8 sps:$4 sm:$0xff]  }
  0x2e   : > { %1164 = vmatprep.subr.bf16.mxu0 %v1748_v45  ;;  %551 = vmatprep.subr.bf16.mxu1 %v1755_v50  ;;  %v2169_v45 = vld [vmem:[%s1967_s6] sm:$0xee]  ;;  %v971_v50 = vrot.slane %v2077_v58, 1  ;;  %v332_v61 = vrot.slane %v330_v48, 1 }
  0x2f   : > { %v1861_v48 = vld [vmem:[%s2365_s1 + $0xc0] ss:$8 sps:$4 sm:$0xff]  }
  0x30   : > { %552 = vmatpush1.bf16.msra.mxu1 %v1757_v52  ;;  %v341_v52 = vsel %vm289_vm0, %v336_v41, %v340_v42  ;;  %v976_v41 = vrot.slane %v2156_v38, 1  ;;  %v1848_v42 = vld [vmem:[%s2365_s1 + $0x90] ss:$8 sps:$4 sm:$0xff]   ;;  %v1859_v38 = vld [vmem:[%s2365_s1 + $0xb4] ss:$8 sps:$4 sm:$0xff]  }
  0x31   : > { %1165 = vmatpush1.bf16.msra.mxu0 %v1746_v47  ;;  %553 = vmatprep.subr.bf16.mxu1 %v1761_v56  ;;  %v1801_v47 = vld [vmem:[%s2365_s1 + $0x2b4] ss:$8 sps:$4 sm:$0xff]   ;;  %v1802_v56 = vld [vmem:[%s2365_s1 + $0x10] ss:$8 sps:$4 sm:$0xff]  }
  0x32   : > { %1166 = vmatprep.subr.bf16.mxu0 %v1754_v49  ;;  %v1598_v49 = vcombine.high %v2169_v45, %v2068_v55 }
  0x34   : > { %1562 = vmatmul.mubr.msk.bf16.gmra.mrb[12].mxu0 %vm524_vm1, %v1975_v13  ;;  %554 = vmatpush1.bf16.msra.mxu1 %v1763_v60  ;;  %v328_v60 = vor.u32 %v326_v44, %v300_v37  ;;  %v1819_v13 = vld [vmem:[%s2365_s1 + $0x2e0] ss:$8 sps:$4 sm:$0xff]   ;;  %v977_v44 = vsel %vm966_vm2, %v968_v30, %v976_v41 }
  0x35   : > { %1167 = vmatpush1.bf16.msra.mxu0 %v1752_v51  ;;  %555 = vmatprep.subr.bf16.mxu1 %v1767_v1  ;;  %v1804_v51 = vld [vmem:[%s2365_s1 + $0x14] ss:$8 sps:$4 sm:$0xff]   ;;  %v1805_v1 = vld [vmem:[%s2365_s1 + $0x2c0] ss:$8 sps:$4 sm:$0xff]  }
  0x36   : > { %1168 = vmatprep.subr.bf16.mxu0 %v1760_v53  ;;  %v970_v53 = vrot.slane %v1598_v49, 1  ;;  %v1854_v37 = vld [vmem:[%s2365_s1 + $0x320] ss:$8 sps:$4 sm:$0xff]   ;;  %v1866_v49 = vld [vmem:[%s2365_s1 + $0xd4] ss:$8 sps:$4 sm:$0xff]  }
  0x38   : > { %556 = vmatpush1.bf16.msra.mxu1 %v1769_v7  ;;  %v972_v62 = vsel %vm966_vm2, %v970_v53, %v971_v50  ;;  %v1818_v7 = vld [vmem:[%s2365_s1 + $0x34] ss:$8 sps:$4 sm:$0xff]   ;;  %v1870_v53 = vld [vmem:[%s2365_s1 + $0xf0] ss:$8 sps:$4 sm:$0xff]  }
  0x39   : > { %1169 = vmatpush1.bf16.msra.mxu0 %v1758_v59  ;;  %557 = vmatprep.subr.bf16.mxu1 %v1773_v12  ;;  %v1807_v59 = vld [vmem:[%s2365_s1 + $0x2c4] ss:$8 sps:$4 sm:$0xff]   ;;  %v1816_v12 = vld [vmem:[%s2365_s1 + $0x30] ss:$8 sps:$4 sm:$0xff]  }
  0x3a   : > { %1170 = vmatprep.subr.bf16.mxu0 %v1766_v0  ;;  %1194 = vmatprep.mubr.bf16.mxu0 %v972_v62  ;;  %v922_v0 = vld [vmem:[%s1967_s6 + $0x8] sm:$0xe] }
  0x3b   : > { %v1599_v4 = vcombine.low %v922_v0, %v1971_v11  ;;  %v1813_v11 = vld [vmem:[%s2365_s1 + $0x2d0] ss:$8 sps:$4 sm:$0xff]  }
  0x3c   : > { %558 = vmatpush1.bf16.msra.mxu1 %v1775_v15  ;;  %v1824_v15 = vld [vmem:[%s2365_s1 + $0x44] ss:$8 sps:$4 sm:$0xff]  }
  0x3d   : > { %1171 = vmatpush1.bf16.msra.mxu0 %v1764_v5  ;;  %559 = vmatprep.subr.bf16.mxu1 %v1779_v20  ;;  %v333_v5 = vsel %vm289_vm0, %v328_v60, %v332_v61  ;;  %v1833_v20 = vld [vmem:[%s2365_s1 + $0x304] ss:$8 sps:$4 sm:$0xff]  }
  0x3e   : > { %1172 = vmatprep.subr.bf16.mxu0 %v1772_v8  ;;  %v973_v8 = vrot.slane %v1599_v4, 1 }
  0x40   : > { %560 = vmatpush1.bf16.msra.mxu1 %v1781_v23  ;;  %v1831_v23 = vld [vmem:[%s2365_s1 + $0x300] ss:$8 sps:$4 sm:$0xff]  }
  0x41   : > { %1173 = vmatpush1.bf16.msra.mxu0 %v1770_v10  ;;  %561 = vmatprep.subr.bf16.mxu1 %v1785_v29  ;;  %v2219_v10 = vsel %vm966_vm2, %v973_v8, %v974_v28  ;;  %v1822_v28 = vld [vmem:[%s2365_s1 + $0x40] ss:$8 sps:$4 sm:$0xff]  }
  0x42   : > { %1174 = vmatprep.subr.bf16.mxu0 %v1778_v17  ;;  %v1825_v17 = vld [vmem:[%s2365_s1 + $0x2f0] ss:$8 sps:$4 sm:$0xff]  }
  0x44   : > { %562 = vmatpush1.bf16.msra.mxu1 %v1787_v34  ;;  %v1856_v34 = vld [vmem:[%s2365_s1 + $0x324] ss:$8 sps:$4 sm:$0xff]  }
  0x45   : > { %1175 = vmatpush1.bf16.msra.mxu0 %v1776_v21  ;;  %815 = vmatprep.subr.bf16.mxu1 %v1798_v39  ;;  %v1836_v21 = vld [vmem:[%s2365_s1 + $0x64] ss:$8 sps:$4 sm:$0xff]  }
  0x46   : > { %1176 = vmatprep.subr.bf16.mxu0 %v1784_v24  ;;  %v1597_v24 = vcombine.low %v2169_v45, %v2068_v55  ;;  %v1837_v55 = vld [vmem:[%s2365_s1 + $0x310] ss:$8 sps:$4 sm:$0xff]   ;;  %v1851_v45 = vld [vmem:[%s2365_s1 + $0xa0] ss:$8 sps:$4 sm:$0xff]  }
  0x47   : > { %564 = vmatmul.mubr.bf16.vlgmr.msra.gmra.mrb[0].mxu1 %v301_v46  ;;  %v1857_v46 = vld [vmem:[%s2365_s1 + $0xb0] ss:$8 sps:$4 sm:$0xff]  }
  0x48   : > { %816 = vmatpush1.bf16.msra.mxu1 %v1796_v43  ;;  %573 = vmatprep.mubr.bf16.mxu1 %v341_v52  ;;  %v967_v29 = vrot.slane %v1597_v24, 1  ;;  %v1853_v43 = vld [vmem:[%s2365_s1 + $0xa4] ss:$8 sps:$4 sm:$0xff]   ;;  %v1867_v52 = vld [vmem:[%s2365_s1 + $0xe0] ss:$8 sps:$4 sm:$0xff]  }
  0x49   : > { %1177 = vmatpush1.bf16.msra.mxu0 %v1782_v32  ;;  %817 = vmatprep.subr.bf16.mxu1 %v1804_v51  ;;  %v978_v32 = vrot.slane %v2132_v22, 1  ;;  %v1845_v22 = vld [vmem:[%s2365_s1 + $0x80] ss:$8 sps:$4 sm:$0xff]   ;;  %v1869_v51 = vld [vmem:[%s2365_s1 + $0xe4] ss:$8 sps:$4 sm:$0xff]  }
  0x4a   : > { %1178 = vmatprep.subr.bf16.mxu0 %v1790_v35  ;;  %v1847_v35 = vld [vmem:[%s2365_s1 + $0x84] ss:$8 sps:$4 sm:$0xff]   ;;  %v969_v36 = vsel %vm966_vm2, %v967_v29, %v968_v30 }
  0x4b   : > { %v979_v39 = vsel %vm966_vm2, %v971_v50, %v978_v32  ;;  %v1864_v50 = vld [vmem:[%s2365_s1 + $0xd0] ss:$8 sps:$4 sm:$0xff]  }
  0x4c   : > { %818 = vmatpush1.bf16.msra.mxu1 %v1802_v56 }
  0x4d   : > { %1179 = vmatpush1.bf16.msra.mxu0 %v1788_v40  ;;  %819 = vmatprep.subr.bf16.mxu1 %v1812_v63  ;;  %v1850_v40 = vld [vmem:[%s2365_s1 + $0x94] ss:$8 sps:$4 sm:$0xff]  }
  0x4e   : > { %1180 = vmatprep.subr.bf16.mxu0 %v1801_v47  ;;  %v1863_v47 = vld [vmem:[%s2365_s1 + $0xc4] ss:$8 sps:$4 sm:$0xff]  }
  0x4f   : > { %574 = vmatmul.mubr.bf16.gmra.mrb[4].mxu1 %v333_v5 }
  0x50   : > { %820 = vmatpush1.bf16.msra.mxu1 %v1810_v3  ;;  %847 = vmatprep.mubr.bf16.mxu1 %v2074_v57  ;;  %v1830_v57 = vld [vmem:[%s2365_s1 + $0x54] ss:$8 sps:$4 sm:$0xff]  }
  0x51   : > { %1181 = vmatpush1.bf16.msra.mxu0 %v1799_v54  ;;  %821 = vmatprep.subr.bf16.mxu1 %v1818_v7 }
  0x52   : > { %1182 = vmatprep.subr.bf16.mxu0 %v1807_v59 }
  0x54   : > { %822 = vmatpush1.bf16.msra.mxu1 %v1816_v12 }
  0x55   : > { %1183 = vmatpush1.bf16.msra.mxu0 %v1805_v1  ;;  %823 = vmatprep.subr.bf16.mxu1 %v1824_v15 }
  0x56   : > { %1184 = vmatprep.subr.bf16.mxu0 %v1815_v6 }
  0x58   : > { %824 = vmatpush1.bf16.msra.mxu1 %v1822_v28 }
  0x59   : > { %1185 = vmatpush1.bf16.msra.mxu0 %v1813_v11  ;;  %825 = vmatprep.subr.bf16.mxu1 %v1830_v57 }
  0x5a   : > { %1186 = vmatprep.subr.bf16.mxu0 %v1821_v14 }
  0x5c   : > { %826 = vmatpush1.bf16.msra.mxu1 %v1828_v19 }
  0x5d   : > { %1187 = vmatpush1.bf16.msra.mxu0 %v1819_v13  ;;  %827 = vmatprep.subr.bf16.mxu1 %v1836_v21 }
  0x5e   : > { %1188 = vmatprep.subr.bf16.mxu0 %v1827_v16 }
  0x60   : > { %828 = vmatpush1.bf16.msra.mxu1 %v1834_v25 }
  0x61   : > { %1189 = vmatpush1.bf16.msra.mxu0 %v1825_v17  ;;  %829 = vmatprep.subr.bf16.mxu1 %v1842_v27 }
  0x62   : > { %1190 = vmatprep.subr.bf16.mxu0 %v1833_v20 }
  0x64   : > { %830 = vmatpush1.bf16.msra.mxu1 %v1840_v31 }
  0x65   : > { %1191 = vmatpush1.bf16.msra.mxu0 %v1831_v23  ;;  %831 = vmatprep.subr.bf16.mxu1 %v1847_v35 }
  0x66   : > { %1192 = vmatprep.subr.bf16.mxu0 %v1839_v26 }
  0x68   : > { %832 = vmatpush1.bf16.msra.mxu1 %v1845_v22 }
  0x69   : > { %1193 = vmatpush1.bf16.msra.mxu0 %v1837_v55  ;;  %833 = vmatprep.subr.bf16.mxu1 %v1850_v40 }
  0x6a   : > { %1215 = vmatprep.subr.bf16.mxu0 %v1856_v34 }
  0x6c   : > { %1195 = vmatmul.mubr.bf16.vlgmr.msra.gmra.mrb[8].mxu0 %v969_v36  ;;  %834 = vmatpush1.bf16.msra.mxu1 %v1848_v42 }
  0x6d   : > { %1204 = vmatprep.mubr.bf16.mxu0 %v979_v39  ;;  %1216 = vmatpush1.bf16.msra.mxu0 %v1854_v37 }
  0x6e   : > { %835 = vmatprep.subr.bf16.mxu1 %v1853_v43 }
  0x70   : > { %836 = vmatpush1.bf16.msra.mxu1 %v1851_v45 }
  0x71   : > { %837 = vmatprep.subr.bf16.mxu1 %v1859_v38 }
  0x74   : > { %1205 = vmatmul.mubr.bf16.gmra.mrb[12].mxu0 %v977_v44  ;;  %838 = vmatpush1.bf16.msra.mxu1 %v1857_v46 }
  0x75   : > { %1247 = vmatprep.mubr.bf16.mxu0 %v1897_v2  ;;  %839 = vmatprep.subr.bf16.mxu1 %v1863_v47 }
  0x78   : > { %840 = vmatpush1.bf16.msra.mxu1 %v1861_v48 }
  0x79   : > { %841 = vmatprep.subr.bf16.mxu1 %v1866_v49 }
  0x7c   : > { %1634 = vmatmul.mubr.msk.bf16.vlgmr.msra.gmra.mrb[8].mxu0 %vm524_vm1, %v2219_v10  ;;  %842 = vmatpush1.bf16.msra.mxu1 %v1864_v50 }
  0x7d   : > { %1257 = vmatprep.mubr.bf16.mxu0 %v1897_v2  ;;  %843 = vmatprep.subr.bf16.mxu1 %v1869_v51  ;;  %v1872_v2 = vld [vmem:[%s2365_s1 + $0xf4] ss:$8 sps:$4 sm:$0xff]  }
  0x80   : > { %844 = vmatpush1.bf16.msra.mxu1 %v1867_v52 }
  0x81   : > { %845 = vmatprep.subr.bf16.mxu1 %v1872_v2 }
  0x84   : > { %1635 = vmatmul.mubr.msk.bf16.gmra.mrb[12].mxu0 %vm524_vm1, %v2007_v33  ;;  %846 = vmatpush1.bf16.msra.mxu1 %v1870_v53 }
  0x87   : > { %848 = vmatmul.mubr.bf16.vlgmr.msra.gmra.mrb[8].mxu1 %v2106_v9  ;;  %v1898_v9 = vmov 0.0  }
  0x88   : > { %857 = vmatprep.mubr.bf16.mxu1 %v2077_v58  ;;  %175 = vst [vmem:[%s2350_s8] sm:$0xf] %v1898_v9 }
  0x8f   : > { %858 = vmatmul.mubr.bf16.gmra.mrb[12].mxu1 %v2123_v18 }
  0xef   : > { %v618_v54 = vpop.f32.mrb[0].mxu0 }
  0xf0   : > { %v620_v56 = vpop.f32.mrb[1].mxu0 }
  0xf1   : > { %v622_v59 = vpop.f32.mrb[2].mxu0 }
  0xf2   : > { %v624_v60 = vpop.f32.mrb[3].mxu0 }
  0xf7   : > { %v628_v61 = vpop.f32.mrb[4].mxu0 }
  0xf8   : > { %v630_v33 = vpop.f32.mrb[5].mxu0 }
  0xf9   : > { %v632_v62 = vpop.f32.mrb[6].mxu0 }
  0xfa   : > { %v634_v63 = vpop.f32.mrb[7].mxu0 }
 0x11a   : > { %v565_v58 = vpop.f32.mrb[0].mxu1 }
 0x11b   : > { %v619_v0 = vadd.f32 %v618_v54, %v565_v58  ;;  %v567_v18 = vpop.f32.mrb[1].mxu1 }
 0x11c   : > { %v621_v1 = vadd.f32 %v620_v56, %v567_v18  ;;  %v569_v3 = vpop.f32.mrb[2].mxu1 }
 0x11d   : > { %v623_v4 = vadd.f32 %v622_v59, %v569_v3  ;;  %v571_v5 = vpop.f32.mrb[3].mxu1 }
 0x11e   : > { %v625_v6 = vadd.f32 %v624_v60, %v571_v5 }
 0x122   : > { %v575_v7 = vpop.f32.mrb[4].mxu1 }
 0x123   : > { %v629_v8 = vadd.f32 %v628_v61, %v575_v7  ;;  %v577_v11 = vpop.f32.mrb[5].mxu1 }
 0x124   : > { %v631_v10 = vadd.f32 %v630_v33, %v577_v11  ;;  %v579_v12 = vpop.f32.mrb[6].mxu1 }
 0x125   : > { %v633_v14 = vadd.f32 %v632_v62, %v579_v12  ;;  %v581_v15 = vpop.f32.mrb[7].mxu1 }
 0x126   : > { %v635_v13 = vadd.f32 %v634_v63, %v581_v15 }
 0x14f   : > { %v1249_v28 = vpop.f32.mrb[8].mxu0 }
 0x150   : > { %v1251_v16 = vpop.f32.mrb[9].mxu0 }
 0x151   : > { %v1253_v57 = vpop.f32.mrb[10].mxu0 }
 0x152   : > { %v1255_v17 = vpop.f32.mrb[11].mxu0 }
 0x157   : > { %v1259_v19 = vpop.f32.mrb[12].mxu0 }
 0x158   : > { %v1261_v20 = vpop.f32.mrb[13].mxu0 }
 0x159   : > { %v1263_v21 = vpop.f32.mrb[14].mxu0 }
 0x15a   : > { %v1265_v23 = vpop.f32.mrb[15].mxu0  ;;  %v849_v24 = vpop.f32.mrb[8].mxu1 }
 0x15b   : > { %v850_v25 = vadd.f32 %v849_v24, %v619_v0  ;;  %v851_v26 = vpop.f32.mrb[9].mxu1 }
 0x15c   : > { %v852_v27 = vadd.f32 %v851_v26, %v621_v1  ;;  %v853_v55 = vpop.f32.mrb[10].mxu1 }
 0x15d   : > { %v1641_v29 = vadd.f32 %v1249_v28, %v850_v25  ;;  %v854_v30 = vadd.f32 %v853_v55, %v623_v4  ;;  %v855_v31 = vpop.f32.mrb[11].mxu1  ;;  %v1899_v28 = vmov 1983009808  }
 0x15e   : > { %v1644_v32 = vadd.f32 %v1251_v16, %v852_v27  ;;  %v856_v34 = vadd.f32 %v855_v31, %v625_v6  ;;  %v1359_v16 = vunpack.c.l.s4 %v1899_v28 }
 0x15f   : > { %v1647_v35 = vadd.f32 %v1253_v57, %v854_v30  ;;  %v1325_v37 = vmul.f32 %v1641_v29, %v1641_v29  ;;  %v1361_v57 = vlaneseq }
 0x160   : > { %v1650_v36 = vadd.f32 %v1255_v17, %v856_v34  ;;  %v1326_v40 = vmul.f32 %v1644_v32, %v1644_v32  ;;  %v1360_v26 = vunpack.c.0.s8 %v1359_v16 }
 0x161   : > { %v1307_v22 = vadd.f32 %v1647_v35, %v1641_v29  ;;  %v1327_v39 = vmul.f32 %v1647_v35, %v1647_v35  ;;  %v1362_v27 = vshrl.u32 %v1361_v57, 7 }
 0x162   : > { %v1316_v41 = vadd.f32 %v1650_v36, %v1644_v32  ;;  %v1328_v42 = vmul.f32 %v1650_v36, %v1650_v36  ;;  %v859_v43 = vpop.f32.mrb[12].mxu1 }
 0x163   : > { %v1333_v44 = vadd.f32 %v1327_v39, %v1325_v37  ;;  %v860_v45 = vadd.f32 %v859_v43, %v629_v8  ;;  %v861_v38 = vpop.f32.mrb[13].mxu1  ;;  %v1363_v35 = vsub.s32 %v1360_v26, %v1362_v27 }
 0x164   : > { %v1342_v46 = vadd.f32 %v1328_v42, %v1326_v40  ;;  %v862_v47 = vadd.f32 %v861_v38, %v631_v10  ;;  %v863_v48 = vpop.f32.mrb[14].mxu1 }
 0x165   : > { %v1653_v49 = vadd.f32 %v1259_v19, %v860_v45  ;;  %v864_v50 = vadd.f32 %v863_v48, %v633_v14  ;;  %v865_v51 = vpop.f32.mrb[15].mxu1 }
 0x166   : > { %v1656_v52 = vadd.f32 %v1261_v20, %v862_v47  ;;  %v866_v2 = vadd.f32 %v865_v51, %v635_v13 }
 0x167   : > { %v1308_v53 = vadd.f32 %v1653_v49, %v1307_v22  ;;  %v1329_v54 = vmul.f32 %v1653_v49, %v1653_v49  ;;  %v1659_v56 = vadd.f32 %v1263_v21, %v864_v50  ;;  %v1354_v22 = vld [vmem:[%s2350_s8] sm:$0xf] }
 0x168   : > { %v1317_v59 = vadd.f32 %v1656_v52, %v1316_v41  ;;  %v1330_v60 = vmul.f32 %v1656_v52, %v1656_v52  ;;  %v1662_v61 = vadd.f32 %v1265_v23, %v866_v2 }
 0x169   : > { %v1334_v33 = vadd.f32 %v1333_v44, %v1329_v54  ;;  %v1309_v62 = vadd.f32 %v1659_v56, %v1308_v53  ;;  %v1331_v63 = vmul.f32 %v1659_v56, %v1659_v56 }
 0x16a   : > { %v1343_v9 = vadd.f32 %v1342_v46, %v1330_v60  ;;  %v1318_v58 = vadd.f32 %v1662_v61, %v1317_v59  ;;  %v1332_v0 = vmul.f32 %v1662_v61, %v1662_v61 }
 0x16b   : > { %v1310_v18 = vrot.slane %v1309_v62, 4  ;;  %v1335_v1 = vadd.f32 %v1334_v33, %v1331_v63 }
 0x16c   : > { %v1319_v3 = vrot.slane %v1318_v58, 4  ;;  %v1344_v4 = vadd.f32 %v1343_v9, %v1332_v0 }
 0x16d   : > { %v1311_v5 = vadd.f32 %v1310_v18, %v1309_v62  ;;  %v1336_v6 = vrot.slane %v1335_v1, 4 }
 0x16e   : > { %v1320_v7 = vadd.f32 %v1319_v3, %v1318_v58  ;;  %v1345_v8 = vrot.slane %v1344_v4, 4 }
 0x16f   : > { %v1312_v11 = vrot.slane %v1311_v5, 2  ;;  %v1337_v10 = vadd.f32 %v1336_v6, %v1335_v1 }
 0x170   : > { %v1321_v12 = vrot.slane %v1320_v7, 2  ;;  %v1346_v14 = vadd.f32 %v1345_v8, %v1344_v4 }
 0x171   : > { %v1313_v15 = vadd.f32 %v1312_v11, %v1311_v5  ;;  %v1338_v13 = vrot.slane %v1337_v10, 2 }
 0x172   : > { %v1322_v17 = vadd.f32 %v1321_v12, %v1320_v7  ;;  %v1347_v19 = vrot.slane %v1346_v14, 2 }
 0x173   : > { %v1314_v20 = vrot.slane %v1313_v15, 1  ;;  %v1339_v21 = vadd.f32 %v1338_v13, %v1337_v10 }
 0x174   : > { %v1323_v23 = vrot.slane %v1322_v17, 1  ;;  %v1348_v24 = vadd.f32 %v1347_v19, %v1346_v14 }
 0x175   : > { %v1340_v25 = vrot.slane %v1339_v21, 1  ;;  %v1315_v29 = vadd.f32 %v1314_v20, %v1313_v15 }
 0x176   : > { %v1349_v55 = vrot.slane %v1348_v24, 1  ;;  %v1324_v31 = vadd.f32 %v1323_v23, %v1322_v17 }
 0x177   : > { %v1341_v30 = vadd.f32 %v1340_v25, %v1339_v21 }
 0x178   : > { %v1350_v32 = vadd.f32 %v1349_v55, %v1348_v24 }
 0x179   : > { %v1352_v34 = vsel %vm1351_vm3, %v1315_v29, %v1341_v30 }
 0x17a   : > { %v1353_v36 = vsel %vm1351_vm3, %v1324_v31, %v1350_v32 }
 0x17b   : > { %v1357_v37 = vcombine.low %v1352_v34, %v1353_v36 }
 0x17d   : > { %v1364_v39 = vrot.slane %v1357_v37, %v1363_v35 }
 0x17f   : > { %v1366_v40 = vadd.f32 %v1364_v39, %v1354_v22 }
 0x181   : > { %1367 = vst [vmem:[%s2350_s8] sm:$0xf] %v1366_v40 }
 0x182 PF: > { %s12_s11 = sadd.s32 1, %s1895_s11   ;;  %s2367_s9 = smov %s1891_s10 }
 0x183   : > { %p9_p5 = scmp.ge.s32.totalorder %s12_s11, 4   ;;  %s2368_s10 = smov %s2370_s12 }
 0x185   :  { %11 = sbr.rel (!%p9_p5) target bundleno = 2 (0x2), region = 64 }

// kernel: up_dysample_forward.5
= control target key start
LH: loop header
LB: loop body
LE: loop exit
PB: predicated region body
PF: predicated region fallthrough
CT: control target
= control target key end

     0   :  { %s1971_s15 = smov 0   ;;  %s1973_s16 = smov 0   ;;  %s2431_s0 = inlined_call_operand.vmem [shape: bf16[2,1,34,272], index: 0, kind: input, shape index: {}]   ;;  %s2432_s1 = inlined_call_operand.vmem [shape: bf16[3,272,256], index: 1, kind: input, shape index: {}]   ;;  %s2433_s2 = inlined_call_operand.vmem [shape: f32[1,256], index: 2, kind: input, shape index: {}]   ;;  %s2434_s3 = inlined_call_operand.vmem [shape: f32[1,256], index: 3, kind: input, shape index: {}]   ;;  %s2435_s4 = inlined_call_operand.vmem [shape: f32[2,32,256], index: 4, kind: output, shape index: {}]  }
   0x1   :  { %s1975_s17 = smov 0  }
   0x2 LB: > { %s26_s18 = sadd.s32 1, %s1939_s16  ;;  %p1494_p0 = scmp.ge.s32.totalorder %s1943_s17, 1  ;;  %s1943_s17 = sphi %s1975_s17, %s14_s17   ;;  %s1939_s16 = sphi %s1973_s16, %s2437_s16   ;;  %s1935_s15 = sphi %s1971_s15, %s2436_s15  }
   0x3   : > { %p28_p1 = scmp.ge.s32.totalorder %s26_s18, 2  ;;  %p182_p2 = scmp.lt.s32.totalorder %s1943_s17, 3 }
   0x5   : > { %s2439_s18 = smov (%p28_p1, %s26_s18), 0  ;;  %p183_p3 = pnand %p1494_p0, %p182_p2 }
   0x6   : > { %v1755_v0 = vld [vmem:[%s2432_s1 + $0x114] ss:$8 sps:$4 sm:$0xff] (!%p183_p3)   ;;  %p217_p4 = scmp.lt.s32.totalorder (!%p183_p3), %s1935_s15, 1  ;;  %v1757_v1 = vld [vmem:[%s2432_s1 + $0x110] ss:$8 sps:$4 sm:$0xff] (!%p183_p3)   ;;  %v1945_v2 = vmov (!%p183_p3), 0  }
   0x7   : > { %186 = sbr.rel (%p183_p3) target bundleno = 369 (0x171), region = 36  ;;  %678 = vmatprep.mubr.bf16.mxu0 (!%p183_p3), %v1945_v2  ;;  %593 = vmatprep.subr.bf16.mxu1 (!%p183_p3), %v1755_v0  ;;  %v1758_v3 = vld [vmem:[%s2432_s1 + $0x124] ss:$8 sps:$4 sm:$0xff] (!%p183_p3)   ;;  %v1760_v4 = vld [vmem:[%s2432_s1 + $0x120] ss:$8 sps:$4 sm:$0xff] (!%p183_p3)   ;;  %vm586_vm1 = vcmask (!%p183_p3), 130048  }
   0x8   : > { %594 = vmatpush1.bf16.msra.mxu1 (!%p183_p3), %v1757_v1  ;;  %v1761_v5 = vld [vmem:[%s2432_s1 + $0x134] ss:$8 sps:$4 sm:$0xff] (!%p183_p3)   ;;  %v1766_v7 = vld [vmem:[%s2432_s1 + $0x210] ss:$8 sps:$4 sm:$0xff] (!%p183_p3)   ;;  %v1767_v9 = vld [vmem:[%s2432_s1 + $0x144] ss:$8 sps:$4 sm:$0xff] (!%p183_p3)  }
   0x9   : > { %595 = vmatprep.subr.bf16.mxu1 (!%p183_p3), %v1758_v3  ;;  %v1764_v6 = vld [vmem:[%s2432_s1 + $0x214] ss:$8 sps:$4 sm:$0xff] (!%p183_p3)   ;;  %v1763_v8 = vld [vmem:[%s2432_s1 + $0x130] ss:$8 sps:$4 sm:$0xff] (!%p183_p3)   ;;  %v1769_v14 = vld [vmem:[%s2432_s1 + $0x140] ss:$8 sps:$4 sm:$0xff] (!%p183_p3)  }
   0xa   : > { %646 = vmatprep.subr.bf16.mxu0 (!%p183_p3), %v1764_v6  ;;  %v1772_v18 = vld [vmem:[%s2432_s1 + $0x154] ss:$8 sps:$4 sm:$0xff] (!%p183_p3)   ;;  %vm351_vm0 = vsmask.f32 (!%p183_p3), 7424  ;;  %v1782_v25 = vld [vmem:[%s2432_s1 + $0x100] ss:$8 sps:$4 sm:$0xff] (!%p183_p3)  }
   0xb   : > { %647 = vmatpush1.bf16.msra.mxu0 (!%p183_p3), %v1766_v7  ;;  %v1784_v26 = vld [vmem:[%s2432_s1 + $0x104] ss:$8 sps:$4 sm:$0xff] (!%p183_p3)   ;;  %v1774_v27 = vld [vmem:[%s2432_s1 + $0x150] ss:$8 sps:$4 sm:$0xff] (!%p183_p3)   ;;  %vm1028_vm2 = vcmask (!%p183_p3), 1046528  }
   0xc   : > { %596 = vmatpush1.bf16.msra.mxu1 (!%p183_p3), %v1760_v4  ;;  %v1775_v31 = vld [vmem:[%s2432_s1 + $0x164] ss:$8 sps:$4 sm:$0xff] (!%p183_p3)   ;;  %930 = vmatprep.subr.bf16.mxu0 (!%p183_p3), %v1784_v26  ;;  %v1777_v36 = vld [vmem:[%s2432_s1 + $0x160] ss:$8 sps:$4 sm:$0xff] (!%p183_p3)   ;;  %v1779_v37 = vld [vmem:[%s2432_s1 + $0x174] ss:$8 sps:$4 sm:$0xff] (!%p183_p3)  }
   0xd   : > { %597 = vmatprep.subr.bf16.mxu1 (!%p183_p3), %v1761_v5  ;;  %v1790_v32 = vld [vmem:[%s2432_s1 + $0x224] ss:$8 sps:$4 sm:$0xff] (!%p183_p3)   ;;  %v1781_v39 = vld [vmem:[%s2432_s1 + $0x170] ss:$8 sps:$4 sm:$0xff] (!%p183_p3)   ;;  %v1787_v41 = vld [vmem:[%s2432_s1 + $0x180] ss:$8 sps:$4 sm:$0xff] (!%p183_p3)  }
   0xe   : > { %s2441_s15 = smov (!%p217_p4, %s1935_s15), 1  ;;  %v1785_v40 = vld [vmem:[%s2432_s1 + $0x184] ss:$8 sps:$4 sm:$0xff]   ;;  %v1791_v42 = vld [vmem:[%s2432_s1 + $0x194] ss:$8 sps:$4 sm:$0xff]  }
   0xf   : > { %s1729_s5 = smul.u32 60, %s2441_s15  ;;  %v1788_v43 = vld [vmem:[%s2432_s1 + $0x220] ss:$8 sps:$4 sm:$0xff]   ;;  %v1793_v44 = vld [vmem:[%s2432_s1 + $0x190] ss:$8 sps:$4 sm:$0xff]   ;;  %s1688_s11 = sshll.u32 %s2441_s15, 6 }
  0x10   : > { %598 = vmatpush1.bf16.msra.mxu1 %v1763_v8  ;;  %v1796_v45 = vld [vmem:[%s2432_s1 + $0x234] ss:$8 sps:$4 sm:$0xff]   ;;  %v1797_v46 = vld [vmem:[%s2432_s1 + $0x1a4] ss:$8 sps:$4 sm:$0xff]   ;;  %v1794_v47 = vld [vmem:[%s2432_s1 + $0x230] ss:$8 sps:$4 sm:$0xff]   ;;  %s2412_s19 = scalar_lea.vmem %s2435_s4, %s1688_s11 }
  0x11   : > { %s2023_s14 = scalar_lea.vmem %s2431_s0, %s1729_s5  ;;  %599 = vmatprep.subr.bf16.mxu1 %v1767_v9  ;;  %v1799_v48 = vld [vmem:[%s2432_s1 + $0x1a0] ss:$8 sps:$4 sm:$0xff]   ;;  %v1802_v49 = vld [vmem:[%s2432_s1 + $0x244] ss:$8 sps:$4 sm:$0xff]   ;;  %v1803_v50 = vld [vmem:[%s2432_s1 + $0x1b4] ss:$8 sps:$4 sm:$0xff]  }
  0x12   : > { %v239_v10 = vld [vmem:[%s2023_s14 + $0x8] sm:$0xf]  ;;  %v2027_v11 = vld [vmem:[%s2023_s14 + $0x14] sm:$0xf]  ;;  %v2031_v13 = vld [vmem:[%s2023_s14 + $0x20] ss:$12 sps:$4 sm:$0xff]  }
  0x13   : > { %v1534_v12 = vcombine.low %v239_v10, %v2027_v11  ;;  %v384_v17 = vshll.u32 %v2031_v13, 16  ;;  %v1778_v21 = vld [vmem:[%s2023_s14 + $0x38] ss:$0 sps:$4 sm:$0x11]   ;;  %v404_v22 = vshrl.u32 %v2031_v13, 16  ;;  %v1036_v28 = vrot.slane %v2031_v13, 1 }
  0x14   : > { %v408_v24 = vshll.u32 %v1778_v21, 16  ;;  %600 = vmatpush1.bf16.msra.mxu1 %v1769_v14  ;;  %v1042_v29 = vrot.slane %v1778_v21, 1  ;;  %v1800_v51 = vld [vmem:[%s2432_s1 + $0x240] ss:$8 sps:$4 sm:$0xff]   ;;  %v1805_v52 = vld [vmem:[%s2432_s1 + $0x1b0] ss:$8 sps:$4 sm:$0xff]  }
  0x15   : > { %v377_v15 = vshrl.u32 %v1534_v12, 16  ;;  %v379_v16 = vshll.u32 %v1534_v12, 16  ;;  %v386_v20 = vrot.slane %v384_v17, 1  ;;  %601 = vmatprep.subr.bf16.mxu1 %v1772_v18  ;;  %v1808_v53 = vld [vmem:[%s2432_s1 + $0x254] ss:$8 sps:$4 sm:$0xff]   ;;  %v238_v54 = vld [vmem:[%s2023_s14] sm:$0xff] }
  0x16   : > { %v2063_v33 = vsel %vm1028_vm2, %v1036_v28, %v1042_v29  ;;  %v410_v35 = vrot.slane %v408_v24, 1  ;;  %v2124_v55 = vld [vmem:[%s2023_s14 + $0xc] sm:$0xff]  ;;  %v2133_v58 = vld [vmem:[%s2023_s14 + $0x1c] ss:$12 sps:$4 sm:$0xff]   ;;  %v2179_v18 = vld [vmem:[%s2023_s14 + $0x18] ss:$12 sps:$4 sm:$0xff]  }
  0x17   : > { %v381_v19 = vrot.slane %v379_v16, 1  ;;  %v406_v34 = vor.u32 %v404_v22, %v386_v20  ;;  %v1809_v56 = vld [vmem:[%s2432_s1 + $0x1c4] ss:$8 sps:$4 sm:$0xff]   ;;  %v2130_v57 = vcombine.high %v238_v54, %v2124_v55  ;;  %v1806_v59 = vld [vmem:[%s2432_s1 + $0x250] ss:$8 sps:$4 sm:$0xff]   ;;  %v372_v63 = vshll.u32 %v2133_v58, 16 }
  0x18   : > { %602 = vmatpush1.bf16.msra.mxu1 %v1774_v27  ;;  %v1811_v60 = vld [vmem:[%s2432_s1 + $0x1c0] ss:$8 sps:$4 sm:$0xff]   ;;  %v1814_v0 = vld [vmem:[%s2432_s1 + $0x264] ss:$8 sps:$4 sm:$0xff]   ;;  %v1815_v1 = vld [vmem:[%s2432_s1 + $0x1d4] ss:$8 sps:$4 sm:$0xff]   ;;  %v2162_v9 = vcombine.low %v238_v54, %v2124_v55 }
  0x19   : > { %v382_v23 = vor.u32 %v381_v19, %v377_v15  ;;  %603 = vmatprep.subr.bf16.mxu1 %v1775_v31  ;;  %v411_v38 = vsel %vm351_vm0, %v406_v34, %v410_v35  ;;  %v365_v61 = vshrl.u32 %v2130_v57, 16  ;;  %v367_v62 = vshll.u32 %v2130_v57, 16  ;;  %v1812_v5 = vld [vmem:[%s2432_s1 + $0x260] ss:$8 sps:$4 sm:$0xff]   ;;  %v1817_v7 = vld [vmem:[%s2432_s1 + $0x1d0] ss:$8 sps:$4 sm:$0xff]  }
  0x1a   : > { %v374_v4 = vrot.slane %v372_v63, 1  ;;  %v1820_v8 = vld [vmem:[%s2432_s1 + $0x274] ss:$8 sps:$4 sm:$0xff]   ;;  %v1818_v10 = vld [vmem:[%s2432_s1 + $0x270] ss:$8 sps:$4 sm:$0xff]   ;;  %v355_v19 = vshll.u32 %v2162_v9, 16 }
  0x1b   : > { %v387_v30 = vsel %vm351_vm0, %v382_v23, %v386_v20  ;;  %v369_v3 = vrot.slane %v367_v62, 1  ;;  %v1823_v15 = vld [vmem:[%s2432_s1 + $0x1e0] ss:$8 sps:$4 sm:$0xff]   ;;  %v280_v16 = vld [vmem:[%s2023_s14 + $0x30] sm:$0x11]  ;;  %v360_v27 = vshll.u32 %v2179_v18, 16 }
  0x1c   : > { %1575 = vmatmul.mubr.msk.bf16.vlgmr.msra.gmra.mrb[0].mxu0 %vm586_vm1, %v387_v30  ;;  %604 = vmatpush1.bf16.msra.mxu1 %v1777_v36  ;;  %v1826_v17 = vld [vmem:[%s2432_s1 + $0x284] ss:$8 sps:$4 sm:$0xff]   ;;  %v1827_v20 = vld [vmem:[%s2432_s1 + $0x1f4] ss:$8 sps:$4 sm:$0xff]   ;;  %v1824_v21 = vld [vmem:[%s2432_s1 + $0x280] ss:$8 sps:$4 sm:$0xff]   ;;  %v2188_v22 = vcombine.high %v280_v16, %v280_v16 }
  0x1d   : > { %688 = vmatprep.mubr.bf16.mxu0 %v1945_v2  ;;  %931 = vmatpush1.bf16.msra.mxu0 %v1782_v25  ;;  %v370_v6 = vor.u32 %v369_v3, %v365_v61  ;;  %v1829_v23 = vld [vmem:[%s2432_s1 + $0x1f0] ss:$8 sps:$4 sm:$0xff]   ;;  %v1832_v24 = vld [vmem:[%s2432_s1 + $0x294] ss:$8 sps:$4 sm:$0xff]   ;;  %v353_v25 = vshrl.u32 %v2162_v9, 16  ;;  %v357_v26 = vrot.slane %v355_v19, 1 }
  0x1e   : > { %1224 = vmatprep.subr.bf16.mxu0 %v1790_v32  ;;  %605 = vmatprep.subr.bf16.mxu1 %v1779_v37  ;;  %v1833_v29 = vld [vmem:[%s2432_s1 + $0x204] ss:$8 sps:$4 sm:$0xff]   ;;  %v396_v30 = vshrl.u32 %v2133_v58, 16  ;;  %v400_v31 = vshll.u32 %v2188_v22, 16  ;;  %v1830_v32 = vld [vmem:[%s2432_s1 + $0x290] ss:$8 sps:$4 sm:$0xff]  }
  0x1f   : > { %v375_v14 = vsel %vm351_vm0, %v370_v6, %v374_v4  ;;  %v1835_v34 = vld [vmem:[%s2432_s1 + $0x200] ss:$8 sps:$4 sm:$0xff]   ;;  %v1838_v35 = vld [vmem:[%s2432_s1 + $0x2a4] ss:$8 sps:$4 sm:$0xff]   ;;  %v358_v36 = vor.u32 %v357_v26, %v353_v25  ;;  %v362_v37 = vrot.slane %v360_v27, 1 }
  0x20   : > { %606 = vmatpush1.bf16.msra.mxu1 %v1781_v39  ;;  %625 = vmatprep.mubr.bf16.mxu1 %v375_v14  ;;  %v1846_v39 = vld [vmem:[%s2432_s1 + $0x4] ss:$8 sps:$4 sm:$0xff]   ;;  %v1847_v54 = vld [vmem:[%s2432_s1 + $0x2b0] ss:$8 sps:$4 sm:$0xff]   ;;  %v1858_v3 = vld [vmem:[%s2432_s1 + $0x20] ss:$8 sps:$4 sm:$0xff]  }
  0x21   : > { %607 = vmatprep.subr.bf16.mxu1 %v1785_v40  ;;  %v1836_v40 = vld [vmem:[%s2432_s1 + $0x2a0] ss:$8 sps:$4 sm:$0xff]   ;;  %v1860_v63 = vld [vmem:[%s2432_s1 + $0x24] ss:$8 sps:$4 sm:$0xff]   ;;  %v1863_v6 = vld [vmem:[%s2432_s1 + $0x2d4] ss:$8 sps:$4 sm:$0xff]  }
  0x22   : > { %v1869_v14 = vld [vmem:[%s2432_s1 + $0x2e4] ss:$8 sps:$4 sm:$0xff]   ;;  %v1876_v19 = vld [vmem:[%s2432_s1 + $0x50] ss:$8 sps:$4 sm:$0xff]   ;;  %v1882_v25 = vld [vmem:[%s2432_s1 + $0x60] ss:$8 sps:$4 sm:$0xff]  }
  0x23   : > { %v1887_v26 = vld [vmem:[%s2432_s1 + $0x314] ss:$8 sps:$4 sm:$0xff]  }
  0x24   : > { %1576 = vmatmul.mubr.msk.bf16.gmra.mrb[4].mxu0 %vm586_vm1, %v411_v38  ;;  %608 = vmatpush1.bf16.msra.mxu1 %v1787_v41  ;;  %v2212_v38 = vcombine.low %v280_v16, %v280_v16  ;;  %v398_v41 = vor.u32 %v396_v30, %v374_v4  ;;  %v1875_v16 = vld [vmem:[%s2432_s1 + $0x2f4] ss:$8 sps:$4 sm:$0xff]   ;;  %v1030_v30 = vrot.slane %v2179_v18, 1 }
  0x25   : > { %962 = vmatprep.mubr.bf16.mxu0 %v1945_v2  ;;  %609 = vmatprep.subr.bf16.mxu1 %v1791_v42  ;;  %v402_v42 = vrot.slane %v400_v31, 1  ;;  %v1890_v27 = vld [vmem:[%s2432_s1 + $0x74] ss:$8 sps:$4 sm:$0xff]   ;;  %v1888_v31 = vld [vmem:[%s2432_s1 + $0x70] ss:$8 sps:$4 sm:$0xff]  }
  0x28   : > { %610 = vmatpush1.bf16.msra.mxu1 %v1793_v44  ;;  %v388_v44 = vshrl.u32 %v2179_v18, 16 }
  0x29   : > { %611 = vmatprep.subr.bf16.mxu1 %v1797_v46  ;;  %v363_v46 = vsel %vm351_vm0, %v358_v36, %v362_v37 }
  0x2c   : > { %1611 = vmatmul.mubr.msk.bf16.vlgmr.msra.gmra.mrb[8].mxu0 %vm586_vm1, %v1534_v12  ;;  %612 = vmatpush1.bf16.msra.mxu1 %v1799_v48  ;;  %v1821_v12 = vld [vmem:[%s2432_s1 + $0x1e4] ss:$8 sps:$4 sm:$0xff]   ;;  %v392_v48 = vshll.u32 %v2212_v38, 16 }
  0x2d   : > { %1225 = vmatpush1.bf16.msra.mxu0 %v1788_v43  ;;  %972 = vmatprep.mubr.bf16.mxu0 %v1945_v2  ;;  %v1844_v43 = vld [vmem:[%s2432_s1] ss:$8 sps:$4 sm:$0xff]  }
  0x2e   : > { %1226 = vmatprep.subr.bf16.mxu0 %v1796_v45  ;;  %613 = vmatprep.subr.bf16.mxu1 %v1803_v50  ;;  %v2225_v45 = vld [vmem:[%s2023_s14] sm:$0xee]  ;;  %v1033_v50 = vrot.slane %v2133_v58, 1  ;;  %v394_v61 = vrot.slane %v392_v48, 1 }
  0x2f   : > { %v1909_v48 = vld [vmem:[%s2432_s1 + $0xc0] ss:$8 sps:$4 sm:$0xff]  }
  0x30   : > { %614 = vmatpush1.bf16.msra.mxu1 %v1805_v52  ;;  %v403_v52 = vsel %vm351_vm0, %v398_v41, %v402_v42  ;;  %v1038_v41 = vrot.slane %v2212_v38, 1  ;;  %v1896_v42 = vld [vmem:[%s2432_s1 + $0x90] ss:$8 sps:$4 sm:$0xff]   ;;  %v1907_v38 = vld [vmem:[%s2432_s1 + $0xb4] ss:$8 sps:$4 sm:$0xff]  }
  0x31   : > { %1227 = vmatpush1.bf16.msra.mxu0 %v1794_v47  ;;  %615 = vmatprep.subr.bf16.mxu1 %v1809_v56  ;;  %v1849_v47 = vld [vmem:[%s2432_s1 + $0x2b4] ss:$8 sps:$4 sm:$0xff]   ;;  %v1850_v56 = vld [vmem:[%s2432_s1 + $0x10] ss:$8 sps:$4 sm:$0xff]  }
  0x32   : > { %1228 = vmatprep.subr.bf16.mxu0 %v1802_v49  ;;  %v1648_v49 = vcombine.high %v2225_v45, %v2124_v55 }
  0x34   : > { %1612 = vmatmul.mubr.msk.bf16.gmra.mrb[12].mxu0 %vm586_vm1, %v2031_v13  ;;  %616 = vmatpush1.bf16.msra.mxu1 %v1811_v60  ;;  %v390_v60 = vor.u32 %v388_v44, %v362_v37  ;;  %v1867_v13 = vld [vmem:[%s2432_s1 + $0x2e0] ss:$8 sps:$4 sm:$0xff]   ;;  %v1039_v44 = vsel %vm1028_vm2, %v1030_v30, %v1038_v41 }
  0x35   : > { %1229 = vmatpush1.bf16.msra.mxu0 %v1800_v51  ;;  %617 = vmatprep.subr.bf16.mxu1 %v1815_v1  ;;  %v1852_v51 = vld [vmem:[%s2432_s1 + $0x14] ss:$8 sps:$4 sm:$0xff]   ;;  %v1853_v1 = vld [vmem:[%s2432_s1 + $0x2c0] ss:$8 sps:$4 sm:$0xff]  }
  0x36   : > { %1230 = vmatprep.subr.bf16.mxu0 %v1808_v53  ;;  %v1032_v53 = vrot.slane %v1648_v49, 1  ;;  %v1902_v37 = vld [vmem:[%s2432_s1 + $0x320] ss:$8 sps:$4 sm:$0xff]   ;;  %v1914_v49 = vld [vmem:[%s2432_s1 + $0xd4] ss:$8 sps:$4 sm:$0xff]  }
  0x38   : > { %618 = vmatpush1.bf16.msra.mxu1 %v1817_v7  ;;  %v1034_v62 = vsel %vm1028_vm2, %v1032_v53, %v1033_v50  ;;  %v1866_v7 = vld [vmem:[%s2432_s1 + $0x34] ss:$8 sps:$4 sm:$0xff]   ;;  %v1918_v53 = vld [vmem:[%s2432_s1 + $0xf0] ss:$8 sps:$4 sm:$0xff]  }
  0x39   : > { %1231 = vmatpush1.bf16.msra.mxu0 %v1806_v59  ;;  %619 = vmatprep.subr.bf16.mxu1 %v1821_v12  ;;  %v1855_v59 = vld [vmem:[%s2432_s1 + $0x2c4] ss:$8 sps:$4 sm:$0xff]   ;;  %v1864_v12 = vld [vmem:[%s2432_s1 + $0x30] ss:$8 sps:$4 sm:$0xff]  }
  0x3a   : > { %1232 = vmatprep.subr.bf16.mxu0 %v1814_v0  ;;  %1256 = vmatprep.mubr.bf16.mxu0 %v1034_v62  ;;  %v984_v0 = vld [vmem:[%s2023_s14 + $0x8] sm:$0xe] }
  0x3b   : > { %v1649_v4 = vcombine.low %v984_v0, %v2027_v11  ;;  %v1861_v11 = vld [vmem:[%s2432_s1 + $0x2d0] ss:$8 sps:$4 sm:$0xff]  }
  0x3c   : > { %620 = vmatpush1.bf16.msra.mxu1 %v1823_v15  ;;  %v1872_v15 = vld [vmem:[%s2432_s1 + $0x44] ss:$8 sps:$4 sm:$0xff]  }
  0x3d   : > { %1233 = vmatpush1.bf16.msra.mxu0 %v1812_v5  ;;  %621 = vmatprep.subr.bf16.mxu1 %v1827_v20  ;;  %v395_v5 = vsel %vm351_vm0, %v390_v60, %v394_v61  ;;  %v1881_v20 = vld [vmem:[%s2432_s1 + $0x304] ss:$8 sps:$4 sm:$0xff]  }
  0x3e   : > { %1234 = vmatprep.subr.bf16.mxu0 %v1820_v8  ;;  %v1035_v8 = vrot.slane %v1649_v4, 1 }
  0x40   : > { %622 = vmatpush1.bf16.msra.mxu1 %v1829_v23  ;;  %v1879_v23 = vld [vmem:[%s2432_s1 + $0x300] ss:$8 sps:$4 sm:$0xff]  }
  0x41   : > { %1235 = vmatpush1.bf16.msra.mxu0 %v1818_v10  ;;  %623 = vmatprep.subr.bf16.mxu1 %v1833_v29  ;;  %v2275_v10 = vsel %vm1028_vm2, %v1035_v8, %v1036_v28  ;;  %v1870_v28 = vld [vmem:[%s2432_s1 + $0x40] ss:$8 sps:$4 sm:$0xff]  }
  0x42   : > { %1236 = vmatprep.subr.bf16.mxu0 %v1826_v17  ;;  %v1873_v17 = vld [vmem:[%s2432_s1 + $0x2f0] ss:$8 sps:$4 sm:$0xff]  }
  0x44   : > { %624 = vmatpush1.bf16.msra.mxu1 %v1835_v34  ;;  %v1904_v34 = vld [vmem:[%s2432_s1 + $0x324] ss:$8 sps:$4 sm:$0xff]  }
  0x45   : > { %1237 = vmatpush1.bf16.msra.mxu0 %v1824_v21  ;;  %877 = vmatprep.subr.bf16.mxu1 %v1846_v39  ;;  %v1884_v21 = vld [vmem:[%s2432_s1 + $0x64] ss:$8 sps:$4 sm:$0xff]  }
  0x46   : > { %1238 = vmatprep.subr.bf16.mxu0 %v1832_v24  ;;  %v1647_v24 = vcombine.low %v2225_v45, %v2124_v55  ;;  %v1885_v55 = vld [vmem:[%s2432_s1 + $0x310] ss:$8 sps:$4 sm:$0xff]   ;;  %v1899_v45 = vld [vmem:[%s2432_s1 + $0xa0] ss:$8 sps:$4 sm:$0xff]  }
  0x47   : > { %626 = vmatmul.mubr.bf16.vlgmr.msra.gmra.mrb[0].mxu1 %v363_v46  ;;  %v1905_v46 = vld [vmem:[%s2432_s1 + $0xb0] ss:$8 sps:$4 sm:$0xff]  }
  0x48   : > { %878 = vmatpush1.bf16.msra.mxu1 %v1844_v43  ;;  %635 = vmatprep.mubr.bf16.mxu1 %v403_v52  ;;  %v1029_v29 = vrot.slane %v1647_v24, 1  ;;  %v1901_v43 = vld [vmem:[%s2432_s1 + $0xa4] ss:$8 sps:$4 sm:$0xff]   ;;  %v1915_v52 = vld [vmem:[%s2432_s1 + $0xe0] ss:$8 sps:$4 sm:$0xff]  }
  0x49   : > { %1239 = vmatpush1.bf16.msra.mxu0 %v1830_v32  ;;  %879 = vmatprep.subr.bf16.mxu1 %v1852_v51  ;;  %v1040_v32 = vrot.slane %v2188_v22, 1  ;;  %v1893_v22 = vld [vmem:[%s2432_s1 + $0x80] ss:$8 sps:$4 sm:$0xff]   ;;  %v1917_v51 = vld [vmem:[%s2432_s1 + $0xe4] ss:$8 sps:$4 sm:$0xff]  }
  0x4a   : > { %1240 = vmatprep.subr.bf16.mxu0 %v1838_v35  ;;  %v1895_v35 = vld [vmem:[%s2432_s1 + $0x84] ss:$8 sps:$4 sm:$0xff]   ;;  %v1031_v36 = vsel %vm1028_vm2, %v1029_v29, %v1030_v30  ;;  %v1358_v29 = vld [vmem:[%s2434_s3] sm:$0x3] }
  0x4b   : > { %v1041_v39 = vsel %vm1028_vm2, %v1033_v50, %v1040_v32  ;;  %v1912_v50 = vld [vmem:[%s2432_s1 + $0xd0] ss:$8 sps:$4 sm:$0xff]  }
  0x4c   : > { %880 = vmatpush1.bf16.msra.mxu1 %v1850_v56 }
  0x4d   : > { %1241 = vmatpush1.bf16.msra.mxu0 %v1836_v40  ;;  %881 = vmatprep.subr.bf16.mxu1 %v1860_v63  ;;  %v1898_v40 = vld [vmem:[%s2432_s1 + $0x94] ss:$8 sps:$4 sm:$0xff]  }
  0x4e   : > { %1242 = vmatprep.subr.bf16.mxu0 %v1849_v47  ;;  %v1911_v47 = vld [vmem:[%s2432_s1 + $0xc4] ss:$8 sps:$4 sm:$0xff]  }
  0x4f   : > { %636 = vmatmul.mubr.bf16.gmra.mrb[4].mxu1 %v395_v5 }
  0x50   : > { %882 = vmatpush1.bf16.msra.mxu1 %v1858_v3  ;;  %909 = vmatprep.mubr.bf16.mxu1 %v2130_v57  ;;  %v1878_v57 = vld [vmem:[%s2432_s1 + $0x54] ss:$8 sps:$4 sm:$0xff]  }
  0x51   : > { %1243 = vmatpush1.bf16.msra.mxu0 %v1847_v54  ;;  %883 = vmatprep.subr.bf16.mxu1 %v1866_v7 }
  0x52   : > { %1244 = vmatprep.subr.bf16.mxu0 %v1855_v59 }
  0x54   : > { %884 = vmatpush1.bf16.msra.mxu1 %v1864_v12 }
  0x55   : > { %1245 = vmatpush1.bf16.msra.mxu0 %v1853_v1  ;;  %885 = vmatprep.subr.bf16.mxu1 %v1872_v15 }
  0x56   : > { %1246 = vmatprep.subr.bf16.mxu0 %v1863_v6 }
  0x58   : > { %886 = vmatpush1.bf16.msra.mxu1 %v1870_v28 }
  0x59   : > { %1247 = vmatpush1.bf16.msra.mxu0 %v1861_v11  ;;  %887 = vmatprep.subr.bf16.mxu1 %v1878_v57 }
  0x5a   : > { %1248 = vmatprep.subr.bf16.mxu0 %v1869_v14 }
  0x5c   : > { %888 = vmatpush1.bf16.msra.mxu1 %v1876_v19 }
  0x5d   : > { %1249 = vmatpush1.bf16.msra.mxu0 %v1867_v13  ;;  %889 = vmatprep.subr.bf16.mxu1 %v1884_v21 }
  0x5e   : > { %1250 = vmatprep.subr.bf16.mxu0 %v1875_v16 }
  0x60   : > { %890 = vmatpush1.bf16.msra.mxu1 %v1882_v25 }
  0x61   : > { %1251 = vmatpush1.bf16.msra.mxu0 %v1873_v17  ;;  %891 = vmatprep.subr.bf16.mxu1 %v1890_v27  ;;  %v1340_v17 = vlaneseq }
  0x62   : > { %1252 = vmatprep.subr.bf16.mxu0 %v1881_v20 }
  0x64   : > { %892 = vmatpush1.bf16.msra.mxu1 %v1888_v31 }
  0x65   : > { %1253 = vmatpush1.bf16.msra.mxu0 %v1879_v23  ;;  %893 = vmatprep.subr.bf16.mxu1 %v1895_v35  ;;  %v1341_v23 = vshrl.u32 %v1340_v17, 7 }
  0x66   : > { %1254 = vmatprep.subr.bf16.mxu0 %v1887_v26  ;;  %v1338_v26 = vld [vmem:[%s2433_s2] sm:$0x3] }
  0x67   : > { %v1342_v25 = vsub.s32 0, %v1341_v23  ;;  %v1346_v27 = vsub.s32 1, %v1341_v23 }
  0x68   : > { %894 = vmatpush1.bf16.msra.mxu1 %v1893_v22 }
  0x69   : > { %1255 = vmatpush1.bf16.msra.mxu0 %v1885_v55  ;;  %895 = vmatprep.subr.bf16.mxu1 %v1898_v40  ;;  %v1343_v31 = vrot.slane %v1338_v26, %v1342_v25  ;;  %v1347_v35 = vrot.slane %v1338_v26, %v1346_v27  ;;  %v1363_v22 = vrot.slane %v1358_v29, %v1342_v25 }
  0x6a   : > { %1277 = vmatprep.subr.bf16.mxu0 %v1904_v34 }
  0x6c   : > { %1257 = vmatmul.mubr.bf16.vlgmr.msra.gmra.mrb[8].mxu0 %v1031_v36  ;;  %896 = vmatpush1.bf16.msra.mxu1 %v1896_v42  ;;  %v1367_v42 = vrot.slane %v1358_v29, %v1346_v27 }
  0x6d   : > { %1266 = vmatprep.mubr.bf16.mxu0 %v1041_v39  ;;  %1278 = vmatpush1.bf16.msra.mxu0 %v1902_v37 }
  0x6e   : > { %897 = vmatprep.subr.bf16.mxu1 %v1901_v43 }
  0x70   : > { %898 = vmatpush1.bf16.msra.mxu1 %v1899_v45 }
  0x71   : > { %899 = vmatprep.subr.bf16.mxu1 %v1907_v38 }
  0x74   : > { %1267 = vmatmul.mubr.bf16.gmra.mrb[12].mxu0 %v1039_v44  ;;  %900 = vmatpush1.bf16.msra.mxu1 %v1905_v46 }
  0x75   : > { %1309 = vmatprep.mubr.bf16.mxu0 %v1945_v2  ;;  %901 = vmatprep.subr.bf16.mxu1 %v1911_v47 }
  0x78   : > { %902 = vmatpush1.bf16.msra.mxu1 %v1909_v48 }
  0x79   : > { %903 = vmatprep.subr.bf16.mxu1 %v1914_v49 }
  0x7c   : > { %1684 = vmatmul.mubr.msk.bf16.vlgmr.msra.gmra.mrb[8].mxu0 %vm586_vm1, %v2275_v10  ;;  %904 = vmatpush1.bf16.msra.mxu1 %v1912_v50 }
  0x7d   : > { %1319 = vmatprep.mubr.bf16.mxu0 %v1945_v2  ;;  %905 = vmatprep.subr.bf16.mxu1 %v1917_v51  ;;  %v1920_v2 = vld [vmem:[%s2432_s1 + $0xf4] ss:$8 sps:$4 sm:$0xff]  }
  0x80   : > { %906 = vmatpush1.bf16.msra.mxu1 %v1915_v52 }
  0x81   : > { %907 = vmatprep.subr.bf16.mxu1 %v1920_v2 }
  0x84   : > { %1685 = vmatmul.mubr.msk.bf16.gmra.mrb[12].mxu0 %vm586_vm1, %v2063_v33  ;;  %908 = vmatpush1.bf16.msra.mxu1 %v1918_v53 }
  0x87   : > { %910 = vmatmul.mubr.bf16.vlgmr.msra.gmra.mrb[8].mxu1 %v2162_v9 }
  0x88   : > { %919 = vmatprep.mubr.bf16.mxu1 %v2133_v58 }
  0x8f   : > { %920 = vmatmul.mubr.bf16.gmra.mrb[12].mxu1 %v2179_v18 }
  0xef   : > { %v680_v54 = vpop.f32.mrb[0].mxu0 }
  0xf0   : > { %v682_v56 = vpop.f32.mrb[1].mxu0 }
  0xf1   : > { %v684_v59 = vpop.f32.mrb[2].mxu0 }
  0xf2   : > { %v686_v60 = vpop.f32.mrb[3].mxu0 }
  0xf7   : > { %v690_v61 = vpop.f32.mrb[4].mxu0 }
  0xf8   : > { %v692_v62 = vpop.f32.mrb[5].mxu0 }
  0xf9   : > { %v694_v33 = vpop.f32.mrb[6].mxu0 }
  0xfa   : > { %v696_v63 = vpop.f32.mrb[7].mxu0 }
 0x11a   : > { %v627_v0 = vpop.f32.mrb[0].mxu1 }
 0x11b   : > { %v681_v1 = vadd.f32 %v680_v54, %v627_v0  ;;  %v629_v3 = vpop.f32.mrb[1].mxu1 }
 0x11c   : > { %v683_v4 = vadd.f32 %v682_v56, %v629_v3  ;;  %v631_v5 = vpop.f32.mrb[2].mxu1 }
 0x11d   : > { %v685_v6 = vadd.f32 %v684_v59, %v631_v5  ;;  %v633_v7 = vpop.f32.mrb[3].mxu1 }
 0x11e   : > { %v687_v9 = vadd.f32 %v686_v60, %v633_v7 }
 0x122   : > { %v637_v8 = vpop.f32.mrb[4].mxu1 }
 0x123   : > { %v691_v58 = vadd.f32 %v690_v61, %v637_v8  ;;  %v639_v11 = vpop.f32.mrb[5].mxu1 }
 0x124   : > { %v693_v18 = vadd.f32 %v692_v62, %v639_v11  ;;  %v641_v10 = vpop.f32.mrb[6].mxu1 }
 0x125   : > { %v695_v12 = vadd.f32 %v694_v33, %v641_v10  ;;  %v643_v14 = vpop.f32.mrb[7].mxu1 }
 0x126   : > { %v697_v15 = vadd.f32 %v696_v63, %v643_v14 }
 0x14f   : > { %v1311_v13 = vpop.f32.mrb[8].mxu0 }
 0x150   : > { %v1313_v28 = vpop.f32.mrb[9].mxu0 }
 0x151   : > { %v1315_v16 = vpop.f32.mrb[10].mxu0 }
 0x152   : > { %v1317_v57 = vpop.f32.mrb[11].mxu0 }
 0x157   : > { %v1321_v19 = vpop.f32.mrb[12].mxu0 }
 0x158   : > { %v1323_v20 = vpop.f32.mrb[13].mxu0 }
 0x159   : > { %v1325_v21 = vpop.f32.mrb[14].mxu0 }
 0x15a   : > { %v1327_v24 = vpop.f32.mrb[15].mxu0  ;;  %v911_v55 = vpop.f32.mrb[8].mxu1 }
 0x15b   : > { %v912_v30 = vadd.f32 %v911_v55, %v681_v1  ;;  %v913_v32 = vpop.f32.mrb[9].mxu1 }
 0x15c   : > { %v914_v34 = vadd.f32 %v913_v32, %v683_v4  ;;  %v915_v36 = vpop.f32.mrb[10].mxu1 }
 0x15d   : > { %v1691_v37 = vadd.f32 %v1311_v13, %v912_v30  ;;  %v916_v39 = vadd.f32 %v915_v36, %v685_v6  ;;  %v917_v40 = vpop.f32.mrb[11].mxu1 }
 0x15e   : > { %v1694_v41 = vadd.f32 %v1313_v28, %v914_v34  ;;  %v918_v43 = vadd.f32 %v917_v40, %v687_v9 }
 0x15f   : > { %v1350_v44 = vmul.f32 %v1691_v37, %v1343_v31  ;;  %v1697_v45 = vadd.f32 %v1315_v16, %v916_v39 }
 0x160   : > { %v1351_v38 = vmul.f32 %v1694_v41, %v1347_v35  ;;  %v1700_v46 = vadd.f32 %v1317_v57, %v918_v43 }
 0x161   : > { %v1370_v47 = vadd.f32 %v1363_v22, %v1350_v44  ;;  %v1352_v48 = vmul.f32 %v1697_v45, %v1343_v31 }
 0x162   : > { %v1371_v49 = vadd.f32 %v1367_v42, %v1351_v38  ;;  %v1353_v50 = vmul.f32 %v1700_v46, %v1347_v35  ;;  %v921_v51 = vpop.f32.mrb[12].mxu1 }
 0x163   : > { %v1378_v52 = vmax.f32 %v1370_v47, 0.0  ;;  %v1372_v2 = vadd.f32 %v1363_v22, %v1352_v48  ;;  %v922_v53 = vadd.f32 %v921_v51, %v691_v58  ;;  %v923_v54 = vpop.f32.mrb[13].mxu1 }
 0x164   : > { %v1379_v56 = vmax.f32 %v1371_v49, 0.0  ;;  %v1373_v59 = vadd.f32 %v1367_v42, %v1353_v50  ;;  %v924_v60 = vadd.f32 %v923_v54, %v693_v18  ;;  %v925_v61 = vpop.f32.mrb[14].mxu1 }
 0x165   : > { %1386 = vst [vmem:[%s2412_s19] sm:$0xff] %v1378_v52  ;;  %v1380_v62 = vmax.f32 %v1372_v2, 0.0  ;;  %v1703_v33 = vadd.f32 %v1321_v19, %v922_v53  ;;  %v926_v63 = vadd.f32 %v925_v61, %v695_v12  ;;  %v927_v0 = vpop.f32.mrb[15].mxu1 }
 0x166   : > { %1387 = vst [vmem:[%s2412_s19 + $0x8] sm:$0xff] %v1379_v56  ;;  %v1381_v1 = vmax.f32 %v1373_v59, 0.0  ;;  %v1706_v3 = vadd.f32 %v1323_v20, %v924_v60  ;;  %v928_v4 = vadd.f32 %v927_v0, %v697_v15 }
 0x167   : > { %1388 = vst [vmem:[%s2412_s19 + $0x10] sm:$0xff] %v1380_v62  ;;  %v1354_v5 = vmul.f32 %v1703_v33, %v1343_v31  ;;  %v1709_v6 = vadd.f32 %v1325_v21, %v926_v63 }
 0x168   : > { %1389 = vst [vmem:[%s2412_s19 + $0x18] sm:$0xff] %v1381_v1  ;;  %v1355_v7 = vmul.f32 %v1706_v3, %v1347_v35  ;;  %v1712_v9 = vadd.f32 %v1327_v24, %v928_v4 }
 0x169   : > { %v1374_v8 = vadd.f32 %v1363_v22, %v1354_v5  ;;  %v1356_v58 = vmul.f32 %v1709_v6, %v1343_v31 }
 0x16a   : > { %v1375_v11 = vadd.f32 %v1367_v42, %v1355_v7  ;;  %v1357_v18 = vmul.f32 %v1712_v9, %v1347_v35 }
 0x16b   : > { %v1382_v10 = vmax.f32 %v1374_v8, 0.0  ;;  %v1376_v12 = vadd.f32 %v1363_v22, %v1356_v58 }
 0x16c   : > { %v1383_v14 = vmax.f32 %v1375_v11, 0.0  ;;  %v1377_v13 = vadd.f32 %v1367_v42, %v1357_v18 }
 0x16d   : > { %1390 = vst [vmem:[%s2412_s19 + $0x20] sm:$0xff] %v1382_v10  ;;  %v1384_v28 = vmax.f32 %v1376_v12, 0.0 }
 0x16e   : > { %1391 = vst [vmem:[%s2412_s19 + $0x28] sm:$0xff] %v1383_v14  ;;  %v1385_v15 = vmax.f32 %v1377_v13, 0.0 }
 0x16f   : > { %1392 = vst [vmem:[%s2412_s19 + $0x30] sm:$0xff] %v1384_v28 }
 0x170   : > { %1393 = vst [vmem:[%s2412_s19 + $0x38] sm:$0xff] %v1385_v15 }
 0x171 PF: > { %s14_s17 = sadd.s32 1, %s1943_s17   ;;  %s2436_s15 = smov %s1939_s16 }
 0x172   : > { %p11_p5 = scmp.ge.s32.totalorder %s14_s17, 4   ;;  %s2437_s16 = smov %s2439_s18 }
 0x174   :  { %13 = sbr.rel (!%p11_p5) target bundleno = 2 (0x2), region = 68 }

</bundles_post_ra>
